<compile_context>
chip_gen: v7x
topology: tpu7x:2x2x1
jax: 0.10.0
libtpu: 0.0.40
codegen_flags: <defaults>
</compile_context>

<pallas_src>
import numpy as np
import jax
import jax.numpy as jnp
from jax import lax
from jax.experimental import pallas as pl
from jax.experimental.pallas import tpu as pltpu  # noqa: F401


# ----------------------------- fused Pallas kernel ---------------------------

def _lenet_fused_kernel(x_ref, s1_ref, m1e_ref, m1o_ref, bc1_ref, d1e_ref,
                        d1o_ref, s2_ref, m2e_ref, m2o_ref, bc2_ref, d2e_ref,
                        d2o_ref, esel_ref, g1_ref, bf1_ref, w2t_ref, bf2_ref,
                        w3t_ref, bf3_ref, out_ref):
    def mm(a, b):
        return jnp.dot(a, b, preferred_element_type=jnp.float32)

    # ---- conv1 + relu + 2x2 max pool ----------------------------------------
    # x: (B*32, 32).  For each kh, S1[kh] selects rows (b, oh+kh); M1e/M1o are
    # banded weights for even / odd output columns (kw and Cout folded in).
    x = x_ref[...]
    t = mm(s1_ref[0], x)                                  # (B*28, 32)
    c1e = mm(t, m1e_ref[0])                               # (B*28, 14*6)
    c1o = mm(t, m1o_ref[0])
    for kh in range(1, 5):
        t = mm(s1_ref[kh], x)
        c1e = c1e + mm(t, m1e_ref[kh])
        c1o = c1o + mm(t, m1o_ref[kh])
    c1 = jnp.maximum(jnp.maximum(c1e, c1o) + bc1_ref[...], 0.0)   # width-pooled
    p1 = jnp.maximum(mm(d1e_ref[...], c1), mm(d1o_ref[...], c1))  # (B*14, 84)

    # ---- conv2 + relu + 2x2 max pool ----------------------------------------
    t = mm(s2_ref[0], p1)                                 # (B*10, 84)
    c2e = mm(t, m2e_ref[0])                               # (B*10, 5*16)
    c2o = mm(t, m2o_ref[0])
    for kh in range(1, 5):
        t = mm(s2_ref[kh], p1)
        c2e = c2e + mm(t, m2e_ref[kh])
        c2o = c2o + mm(t, m2o_ref[kh])
    c2 = jnp.maximum(jnp.maximum(c2e, c2o) + bc2_ref[...], 0.0)
    p2 = jnp.maximum(mm(d2e_ref[...], c2), mm(d2o_ref[...], c2))  # (B*5, 80)

    # ---- flatten (PyTorch (C,H,W) order folded into g1 blocks) + fc1/2/3 ----
    h1 = mm(mm(esel_ref[0], p2), g1_ref[0])               # (B, 120)
    for h in range(1, 5):
        h1 = h1 + mm(mm(esel_ref[h], p2), g1_ref[h])
    h1 = jnp.maximum(h1 + bf1_ref[...], 0.0)
    h2 = jnp.maximum(mm(h1, w2t_ref[...]) + bf2_ref[...], 0.0)    # (B, 84)
    out_ref[...] = mm(h2, w3t_ref[...]) + bf3_ref[...]            # (B, 10)


# ------------------------- one-time weight preparation -----------------------

def _selection_constants(B):
    """Constant 0/1 matrices: kh row shifts, height-pool pickers, flatten pickers."""
    def row_pool(OH):
        PH = OH // 2
        de = np.zeros((B * PH, B * OH), np.float32)
        do = np.zeros((B * PH, B * OH), np.float32)
        for b in range(B):
            for p in range(PH):
                de[b * PH + p, b * OH + 2 * p] = 1.0
                do[b * PH + p, b * OH + 2 * p + 1] = 1.0
        return jnp.asarray(de), jnp.asarray(do)

    def row_shift(OH, H_in, K):
        s = np.zeros((K, B * OH, B * H_in), np.float32)
        for kh in range(K):
            for b in range(B):
                for oh in range(OH):
                    s[kh, b * OH + oh, b * H_in + oh + kh] = 1.0
        return jnp.asarray(s)

    d1e, d1o = row_pool(28)
    d2e, d2o = row_pool(10)
    s1 = row_shift(28, 32, 5)
    s2 = row_shift(10, 14, 5)

    esel = np.zeros((5, B, B * 5), np.float32)
    for h in range(5):
        for b in range(B):
            esel[h, b, b * 5 + h] = 1.0
    return s1, d1e, d1o, s2, d2e, d2o, jnp.asarray(esel)


def _band_indicator(w_in, pw_out, k, parity):
    # ind[w, pw, kw] = 1  iff  w == 2*pw + parity + kw   (valid conv, stride 1,
    # followed by a 2-wide width pool; parity picks the pool-window column).
    ind = np.zeros((w_in, pw_out, k), np.float32)
    for p in range(pw_out):
        for q in range(k):
            ind[2 * p + parity + q, p, q] = 1.0
    return jnp.asarray(ind)


def prepare_params(params, batch):
    """Fold conv kernels and the fc1 flatten permutation into the constant
    matrices consumed by the fused kernel (tiny, weight-side only)."""
    w1, b1, w2, b2, fw1, fb1, fw2, fb2, fw3, fb3 = params
    s1, d1e, d1o, s2, d2e, d2o, esel = _selection_constants(batch)

    i1e, i1o = _band_indicator(32, 14, 5, 0), _band_indicator(32, 14, 5, 1)
    i2e, i2o = _band_indicator(14, 5, 5, 0), _band_indicator(14, 5, 5, 1)

    # conv1: M1[kh][w, pw*6+co] = w1[co, 0, kh, w - (2*pw + parity)]
    m1e = jnp.einsum('wpq,chq->hwpc', i1e, w1[:, 0]).reshape(5, 32, 14 * 6)
    m1o = jnp.einsum('wpq,chq->hwpc', i1o, w1[:, 0]).reshape(5, 32, 14 * 6)
    # conv2: M2[kh][w*6+c, pw*16+co] = w2[co, c, kh, w - (2*pw + parity)]
    m2e = jnp.einsum('wpq,ochq->hwcpo', i2e, w2).reshape(5, 14 * 6, 5 * 16)
    m2o = jnp.einsum('wpq,ochq->hwcpo', i2o, w2).reshape(5, 14 * 6, 5 * 16)

    bc1 = jnp.tile(b1, 14)[None, :]        # (1, 84), column layout pw*6 + co
    bc2 = jnp.tile(b2, 5)[None, :]         # (1, 80), column layout pw*16 + co

    # fc1 acts on p2 rows (b, h) with columns (w*16 + c); PyTorch flattens in
    # (c, h, w) order -> fold the permutation into per-h weight blocks.
    g1 = jnp.transpose(fw1.reshape(120, 16, 5, 5), (2, 3, 1, 0)).reshape(5, 80, 120)

    return (s1, m1e, m1o, bc1, d1e, d1o,
            s2, m2e, m2o, bc2, d2e, d2o,
            esel, g1, fb1[None, :], fw2.T, fb2[None, :], fw3.T, fb3[None, :])


def net_pallas(x_nchw, prepped):
    B = x_nchw.shape[0]
    assert x_nchw.shape[1:] == (1, 32, 32), x_nchw.shape
    x2d = x_nchw.reshape(B * 32, 32)       # free reshape (NCHW with C == 1)
    return pl.pallas_call(
        _lenet_fused_kernel,
        out_shape=jax.ShapeDtypeStruct((B, 10), jnp.float32),
    )(x2d, *prepped)


# ------------------------------ pure-JAX reference ---------------------------

def net_reference(x_nchw, params):
    w1, b1, w2, b2, fw1, fb1, fw2, fb2, fw3, fb3 = params

    def conv(x, w, b):
        y = lax.conv_general_dilated(
            x, w, window_strides=(1, 1), padding="VALID",
            dimension_numbers=("NCHW", "OIHW", "NCHW"),
            precision=lax.Precision.HIGHEST)
        return jnp.maximum(y + b.reshape(1, -1, 1, 1), 0.0)

    def pool(x):
        return lax.reduce_window(x, -jnp.inf, lax.max,
                                 (1, 1, 2, 2), (1, 1, 2, 2), "VALID")

    x = pool(conv(x_nchw, w1, b1))
    x = pool(conv(x, w2, b2))
    x = x.reshape(x.shape[0], -1)
    x = jnp.maximum(x @ fw1.T + fb1, 0.0)
    x = jnp.maximum(x @ fw2.T + fb2, 0.0)
    return x @ fw3.T + fb3


# ----------------------------------- main -------------------------------------

if __name__ == "__main__":
    key = jax.random.PRNGKey(0)
    ks = jax.random.split(key, 11)

    # deterministic parameter init (PyTorch weight shapes)
    params = (
        0.1 * jax.random.normal(ks[0], (6, 1, 5, 5), jnp.float32),    # conv1.w
        0.1 * jax.random.normal(ks[1], (6,), jnp.float32),            # conv1.b
        0.1 * jax.random.normal(ks[2], (16, 6, 5, 5), jnp.float32),   # conv2.w
        0.1 * jax.random.normal(ks[3], (16,), jnp.float32),           # conv2.b
        0.1 * jax.random.normal(ks[4], (120, 400), jnp.float32),      # fc1.w
        0.1 * jax.random.normal(ks[5], (120,), jnp.float32),          # fc1.b
        0.1 * jax.random.normal(ks[6], (84, 120), jnp.float32),       # fc2.w
        0.1 * jax.random.normal(ks[7], (84,), jnp.float32),           # fc2.b
        0.1 * jax.random.normal(ks[8], (10, 84), jnp.float32),        # fc3.w
        0.1 * jax.random.normal(ks[9], (10,), jnp.float32),           # fc3.b
    )

    # Input must be 32x32 so the flatten hits 16*5*5 = 400 (as in the module).
    x = jax.random.normal(ks[10], (2, 1, 32, 32), jnp.float32)

    prepped = prepare_params(params, batch=x.shape[0])    # one-time weight prep
    fwd = jax.jit(net_pallas)
    out = jax.block_until_ready(fwd(x, prepped))
    assert out.shape == (2, 10), out.shape

    ref = jax.block_until_ready(net_reference(x, params))
    np.testing.assert_allclose(np.asarray(out), np.asarray(ref),
                               rtol=2e-2, atol=2e-2)

    print("KERNEL_OK")
</pallas_src>

<mosaic_0001>
module attributes {stable_mosaic.version = 11 : i64} {
  func.func @_lenet_fused_kernel(%arg0: memref<64x32xf32, #tpu.memory_space<vmem>>, %arg1: memref<5x56x64xf32, #tpu.memory_space<vmem>>, %arg2: memref<5x32x84xf32, #tpu.memory_space<vmem>>, %arg3: memref<5x32x84xf32, #tpu.memory_space<vmem>>, %arg4: memref<1x84xf32, #tpu.memory_space<vmem>>, %arg5: memref<28x56xf32, #tpu.memory_space<vmem>>, %arg6: memref<28x56xf32, #tpu.memory_space<vmem>>, %arg7: memref<5x20x28xf32, #tpu.memory_space<vmem>>, %arg8: memref<5x84x80xf32, #tpu.memory_space<vmem>>, %arg9: memref<5x84x80xf32, #tpu.memory_space<vmem>>, %arg10: memref<1x80xf32, #tpu.memory_space<vmem>>, %arg11: memref<10x20xf32, #tpu.memory_space<vmem>>, %arg12: memref<10x20xf32, #tpu.memory_space<vmem>>, %arg13: memref<5x2x10xf32, #tpu.memory_space<vmem>>, %arg14: memref<5x80x120xf32, #tpu.memory_space<vmem>>, %arg15: memref<1x120xf32, #tpu.memory_space<vmem>>, %arg16: memref<120x84xf32, #tpu.memory_space<vmem>>, %arg17: memref<1x84xf32, #tpu.memory_space<vmem>>, %arg18: memref<84x10xf32, #tpu.memory_space<vmem>>, %arg19: memref<1x10xf32, #tpu.memory_space<vmem>>, %arg20: memref<2x10xf32, #tpu.memory_space<vmem>>) attributes {dimension_semantics = [], scalar_prefetch = 0 : i64, scratch_operands = 0 : i64, tpu.core_type = #tpu.core_type<tc>} {
    %c0 = arith.constant 0 : index
    %c0_0 = arith.constant 0 : index
    %0 = vector.load %arg0[%c0, %c0_0] : memref<64x32xf32, #tpu.memory_space<vmem>>, vector<64x32xf32>
    %c0_1 = arith.constant 0 : index
    %c0_2 = arith.constant 0 : index
    %c0_3 = arith.constant 0 : index
    %1 = vector.load %arg1[%c0_1, %c0_2, %c0_3] : memref<5x56x64xf32, #tpu.memory_space<vmem>>, vector<1x56x64xf32>
    %2 = vector.shape_cast %1 : vector<1x56x64xf32> to vector<56x64xf32>
    %cst = arith.constant dense<0.000000e+00> : vector<56x32xf32>
    %3 = tpu.matmul %2, %0, %cst {dimension_numbers = #tpu.dot_dimension_numbers<[1], [0], [0], [1], [0, 0, 1, 1], [], []>} : vector<56x64xf32>, vector<64x32xf32>, vector<56x32xf32> -> vector<56x32xf32>
    %c0_4 = arith.constant 0 : index
    %c0_5 = arith.constant 0 : index
    %c0_6 = arith.constant 0 : index
    %4 = vector.load %arg2[%c0_4, %c0_5, %c0_6] : memref<5x32x84xf32, #tpu.memory_space<vmem>>, vector<1x32x84xf32>
    %5 = vector.shape_cast %4 : vector<1x32x84xf32> to vector<32x84xf32>
    %cst_7 = arith.constant dense<0.000000e+00> : vector<56x84xf32>
    %6 = tpu.matmul %3, %5, %cst_7 {dimension_numbers = #tpu.dot_dimension_numbers<[1], [0], [0], [1], [0, 0, 1, 1], [], []>} : vector<56x32xf32>, vector<32x84xf32>, vector<56x84xf32> -> vector<56x84xf32>
    %c0_8 = arith.constant 0 : index
    %c0_9 = arith.constant 0 : index
    %c0_10 = arith.constant 0 : index
    %7 = vector.load %arg3[%c0_8, %c0_9, %c0_10] : memref<5x32x84xf32, #tpu.memory_space<vmem>>, vector<1x32x84xf32>
    %8 = vector.shape_cast %7 : vector<1x32x84xf32> to vector<32x84xf32>
    %cst_11 = arith.constant dense<0.000000e+00> : vector<56x84xf32>
    %9 = tpu.matmul %3, %8, %cst_11 {dimension_numbers = #tpu.dot_dimension_numbers<[1], [0], [0], [1], [0, 0, 1, 1], [], []>} : vector<56x32xf32>, vector<32x84xf32>, vector<56x84xf32> -> vector<56x84xf32>
    %c1 = arith.constant 1 : index
    %c0_12 = arith.constant 0 : index
    %c0_13 = arith.constant 0 : index
    %10 = vector.load %arg1[%c1, %c0_12, %c0_13] : memref<5x56x64xf32, #tpu.memory_space<vmem>>, vector<1x56x64xf32>
    %11 = vector.shape_cast %10 : vector<1x56x64xf32> to vector<56x64xf32>
    %cst_14 = arith.constant dense<0.000000e+00> : vector<56x32xf32>
    %12 = tpu.matmul %11, %0, %cst_14 {dimension_numbers = #tpu.dot_dimension_numbers<[1], [0], [0], [1], [0, 0, 1, 1], [], []>} : vector<56x64xf32>, vector<64x32xf32>, vector<56x32xf32> -> vector<56x32xf32>
    %c1_15 = arith.constant 1 : index
    %c0_16 = arith.constant 0 : index
    %c0_17 = arith.constant 0 : index
    %13 = vector.load %arg2[%c1_15, %c0_16, %c0_17] : memref<5x32x84xf32, #tpu.memory_space<vmem>>, vector<1x32x84xf32>
    %14 = vector.shape_cast %13 : vector<1x32x84xf32> to vector<32x84xf32>
    %cst_18 = arith.constant dense<0.000000e+00> : vector<56x84xf32>
    %15 = tpu.matmul %12, %14, %cst_18 {dimension_numbers = #tpu.dot_dimension_numbers<[1], [0], [0], [1], [0, 0, 1, 1], [], []>} : vector<56x32xf32>, vector<32x84xf32>, vector<56x84xf32> -> vector<56x84xf32>
    %16 = arith.addf %6, %15 : vector<56x84xf32>
    %c1_19 = arith.constant 1 : index
    %c0_20 = arith.constant 0 : index
    %c0_21 = arith.constant 0 : index
    %17 = vector.load %arg3[%c1_19, %c0_20, %c0_21] : memref<5x32x84xf32, #tpu.memory_space<vmem>>, vector<1x32x84xf32>
    %18 = vector.shape_cast %17 : vector<1x32x84xf32> to vector<32x84xf32>
    %cst_22 = arith.constant dense<0.000000e+00> : vector<56x84xf32>
    %19 = tpu.matmul %12, %18, %cst_22 {dimension_numbers = #tpu.dot_dimension_numbers<[1], [0], [0], [1], [0, 0, 1, 1], [], []>} : vector<56x32xf32>, vector<32x84xf32>, vector<56x84xf32> -> vector<56x84xf32>
    %20 = arith.addf %9, %19 : vector<56x84xf32>
    %c2 = arith.constant 2 : index
    %c0_23 = arith.constant 0 : index
    %c0_24 = arith.constant 0 : index
    %21 = vector.load %arg1[%c2, %c0_23, %c0_24] : memref<5x56x64xf32, #tpu.memory_space<vmem>>, vector<1x56x64xf32>
    %22 = vector.shape_cast %21 : vector<1x56x64xf32> to vector<56x64xf32>
    %cst_25 = arith.constant dense<0.000000e+00> : vector<56x32xf32>
    %23 = tpu.matmul %22, %0, %cst_25 {dimension_numbers = #tpu.dot_dimension_numbers<[1], [0], [0], [1], [0, 0, 1, 1], [], []>} : vector<56x64xf32>, vector<64x32xf32>, vector<56x32xf32> -> vector<56x32xf32>
    %c2_26 = arith.constant 2 : index
    %c0_27 = arith.constant 0 : index
    %c0_28 = arith.constant 0 : index
    %24 = vector.load %arg2[%c2_26, %c0_27, %c0_28] : memref<5x32x84xf32, #tpu.memory_space<vmem>>, vector<1x32x84xf32>
    %25 = vector.shape_cast %24 : vector<1x32x84xf32> to vector<32x84xf32>
    %cst_29 = arith.constant dense<0.000000e+00> : vector<56x84xf32>
    %26 = tpu.matmul %23, %25, %cst_29 {dimension_numbers = #tpu.dot_dimension_numbers<[1], [0], [0], [1], [0, 0, 1, 1], [], []>} : vector<56x32xf32>, vector<32x84xf32>, vector<56x84xf32> -> vector<56x84xf32>
    %27 = arith.addf %16, %26 : vector<56x84xf32>
    %c2_30 = arith.constant 2 : index
    %c0_31 = arith.constant 0 : index
    %c0_32 = arith.constant 0 : index
    %28 = vector.load %arg3[%c2_30, %c0_31, %c0_32] : memref<5x32x84xf32, #tpu.memory_space<vmem>>, vector<1x32x84xf32>
    %29 = vector.shape_cast %28 : vector<1x32x84xf32> to vector<32x84xf32>
    %cst_33 = arith.constant dense<0.000000e+00> : vector<56x84xf32>
    %30 = tpu.matmul %23, %29, %cst_33 {dimension_numbers = #tpu.dot_dimension_numbers<[1], [0], [0], [1], [0, 0, 1, 1], [], []>} : vector<56x32xf32>, vector<32x84xf32>, vector<56x84xf32> -> vector<56x84xf32>
    %31 = arith.addf %20, %30 : vector<56x84xf32>
    %c3 = arith.constant 3 : index
    %c0_34 = arith.constant 0 : index
    %c0_35 = arith.constant 0 : index
    %32 = vector.load %arg1[%c3, %c0_34, %c0_35] : memref<5x56x64xf32, #tpu.memory_space<vmem>>, vector<1x56x64xf32>
    %33 = vector.shape_cast %32 : vector<1x56x64xf32> to vector<56x64xf32>
    %cst_36 = arith.constant dense<0.000000e+00> : vector<56x32xf32>
    %34 = tpu.matmul %33, %0, %cst_36 {dimension_numbers = #tpu.dot_dimension_numbers<[1], [0], [0], [1], [0, 0, 1, 1], [], []>} : vector<56x64xf32>, vector<64x32xf32>, vector<56x32xf32> -> vector<56x32xf32>
    %c3_37 = arith.constant 3 : index
    %c0_38 = arith.constant 0 : index
    %c0_39 = arith.constant 0 : index
    %35 = vector.load %arg2[%c3_37, %c0_38, %c0_39] : memref<5x32x84xf32, #tpu.memory_space<vmem>>, vector<1x32x84xf32>
    %36 = vector.shape_cast %35 : vector<1x32x84xf32> to vector<32x84xf32>
    %cst_40 = arith.constant dense<0.000000e+00> : vector<56x84xf32>
    %37 = tpu.matmul %34, %36, %cst_40 {dimension_numbers = #tpu.dot_dimension_numbers<[1], [0], [0], [1], [0, 0, 1, 1], [], []>} : vector<56x32xf32>, vector<32x84xf32>, vector<56x84xf32> -> vector<56x84xf32>
    %38 = arith.addf %27, %37 : vector<56x84xf32>
    %c3_41 = arith.constant 3 : index
    %c0_42 = arith.constant 0 : index
    %c0_43 = arith.constant 0 : index
    %39 = vector.load %arg3[%c3_41, %c0_42, %c0_43] : memref<5x32x84xf32, #tpu.memory_space<vmem>>, vector<1x32x84xf32>
    %40 = vector.shape_cast %39 : vector<1x32x84xf32> to vector<32x84xf32>
    %cst_44 = arith.constant dense<0.000000e+00> : vector<56x84xf32>
    %41 = tpu.matmul %34, %40, %cst_44 {dimension_numbers = #tpu.dot_dimension_numbers<[1], [0], [0], [1], [0, 0, 1, 1], [], []>} : vector<56x32xf32>, vector<32x84xf32>, vector<56x84xf32> -> vector<56x84xf32>
    %42 = arith.addf %31, %41 : vector<56x84xf32>
    %c4 = arith.constant 4 : index
    %c0_45 = arith.constant 0 : index
    %c0_46 = arith.constant 0 : index
    %43 = vector.load %arg1[%c4, %c0_45, %c0_46] : memref<5x56x64xf32, #tpu.memory_space<vmem>>, vector<1x56x64xf32>
    %44 = vector.shape_cast %43 : vector<1x56x64xf32> to vector<56x64xf32>
    %cst_47 = arith.constant dense<0.000000e+00> : vector<56x32xf32>
    %45 = tpu.matmul %44, %0, %cst_47 {dimension_numbers = #tpu.dot_dimension_numbers<[1], [0], [0], [1], [0, 0, 1, 1], [], []>} : vector<56x64xf32>, vector<64x32xf32>, vector<56x32xf32> -> vector<56x32xf32>
    %c4_48 = arith.constant 4 : index
    %c0_49 = arith.constant 0 : index
    %c0_50 = arith.constant 0 : index
    %46 = vector.load %arg2[%c4_48, %c0_49, %c0_50] : memref<5x32x84xf32, #tpu.memory_space<vmem>>, vector<1x32x84xf32>
    %47 = vector.shape_cast %46 : vector<1x32x84xf32> to vector<32x84xf32>
    %cst_51 = arith.constant dense<0.000000e+00> : vector<56x84xf32>
    %48 = tpu.matmul %45, %47, %cst_51 {dimension_numbers = #tpu.dot_dimension_numbers<[1], [0], [0], [1], [0, 0, 1, 1], [], []>} : vector<56x32xf32>, vector<32x84xf32>, vector<56x84xf32> -> vector<56x84xf32>
    %49 = arith.addf %38, %48 : vector<56x84xf32>
    %c4_52 = arith.constant 4 : index
    %c0_53 = arith.constant 0 : index
    %c0_54 = arith.constant 0 : index
    %50 = vector.load %arg3[%c4_52, %c0_53, %c0_54] : memref<5x32x84xf32, #tpu.memory_space<vmem>>, vector<1x32x84xf32>
    %51 = vector.shape_cast %50 : vector<1x32x84xf32> to vector<32x84xf32>
    %cst_55 = arith.constant dense<0.000000e+00> : vector<56x84xf32>
    %52 = tpu.matmul %45, %51, %cst_55 {dimension_numbers = #tpu.dot_dimension_numbers<[1], [0], [0], [1], [0, 0, 1, 1], [], []>} : vector<56x32xf32>, vector<32x84xf32>, vector<56x84xf32> -> vector<56x84xf32>
    %53 = arith.addf %42, %52 : vector<56x84xf32>
    %54 = arith.maximumf %49, %53 : vector<56x84xf32>
    %c0_56 = arith.constant 0 : index
    %c0_57 = arith.constant 0 : index
    %55 = vector.load %arg4[%c0_56, %c0_57] : memref<1x84xf32, #tpu.memory_space<vmem>>, vector<1x84xf32>
    %56 = vector.broadcast %55 : vector<1x84xf32> to vector<56x84xf32>
    %57 = arith.addf %54, %56 : vector<56x84xf32>
    %cst_58 = arith.constant 0.000000e+00 : f32
    %58 = vector.broadcast %cst_58 : f32 to vector<56x84xf32>
    %59 = arith.maximumf %57, %58 : vector<56x84xf32>
    %c0_59 = arith.constant 0 : index
    %c0_60 = arith.constant 0 : index
    %60 = vector.load %arg5[%c0_59, %c0_60] : memref<28x56xf32, #tpu.memory_space<vmem>>, vector<28x56xf32>
    %cst_61 = arith.constant dense<0.000000e+00> : vector<28x84xf32>
    %61 = tpu.matmul %60, %59, %cst_61 {dimension_numbers = #tpu.dot_dimension_numbers<[1], [0], [0], [1], [0, 0, 1, 1], [], []>} : vector<28x56xf32>, vector<56x84xf32>, vector<28x84xf32> -> vector<28x84xf32>
    %c0_62 = arith.constant 0 : index
    %c0_63 = arith.constant 0 : index
    %62 = vector.load %arg6[%c0_62, %c0_63] : memref<28x56xf32, #tpu.memory_space<vmem>>, vector<28x56xf32>
    %cst_64 = arith.constant dense<0.000000e+00> : vector<28x84xf32>
    %63 = tpu.matmul %62, %59, %cst_64 {dimension_numbers = #tpu.dot_dimension_numbers<[1], [0], [0], [1], [0, 0, 1, 1], [], []>} : vector<28x56xf32>, vector<56x84xf32>, vector<28x84xf32> -> vector<28x84xf32>
    %64 = arith.maximumf %61, %63 : vector<28x84xf32>
    %c0_65 = arith.constant 0 : index
    %c0_66 = arith.constant 0 : index
    %c0_67 = arith.constant 0 : index
    %65 = vector.load %arg7[%c0_65, %c0_66, %c0_67] : memref<5x20x28xf32, #tpu.memory_space<vmem>>, vector<1x20x28xf32>
    %66 = vector.shape_cast %65 : vector<1x20x28xf32> to vector<20x28xf32>
    %cst_68 = arith.constant dense<0.000000e+00> : vector<20x84xf32>
    %67 = tpu.matmul %66, %64, %cst_68 {dimension_numbers = #tpu.dot_dimension_numbers<[1], [0], [0], [1], [0, 0, 1, 1], [], []>} : vector<20x28xf32>, vector<28x84xf32>, vector<20x84xf32> -> vector<20x84xf32>
    %c0_69 = arith.constant 0 : index
    %c0_70 = arith.constant 0 : index
    %c0_71 = arith.constant 0 : index
    %68 = vector.load %arg8[%c0_69, %c0_70, %c0_71] : memref<5x84x80xf32, #tpu.memory_space<vmem>>, vector<1x84x80xf32>
    %69 = vector.shape_cast %68 : vector<1x84x80xf32> to vector<84x80xf32>
    %cst_72 = arith.constant dense<0.000000e+00> : vector<20x80xf32>
    %70 = tpu.matmul %67, %69, %cst_72 {dimension_numbers = #tpu.dot_dimension_numbers<[1], [0], [0], [1], [0, 0, 1, 1], [], []>} : vector<20x84xf32>, vector<84x80xf32>, vector<20x80xf32> -> vector<20x80xf32>
    %c0_73 = arith.constant 0 : index
    %c0_74 = arith.constant 0 : index
    %c0_75 = arith.constant 0 : index
    %71 = vector.load %arg9[%c0_73, %c0_74, %c0_75] : memref<5x84x80xf32, #tpu.memory_space<vmem>>, vector<1x84x80xf32>
    %72 = vector.shape_cast %71 : vector<1x84x80xf32> to vector<84x80xf32>
    %cst_76 = arith.constant dense<0.000000e+00> : vector<20x80xf32>
    %73 = tpu.matmul %67, %72, %cst_76 {dimension_numbers = #tpu.dot_dimension_numbers<[1], [0], [0], [1], [0, 0, 1, 1], [], []>} : vector<20x84xf32>, vector<84x80xf32>, vector<20x80xf32> -> vector<20x80xf32>
    %c1_77 = arith.constant 1 : index
    %c0_78 = arith.constant 0 : index
    %c0_79 = arith.constant 0 : index
    %74 = vector.load %arg7[%c1_77, %c0_78, %c0_79] : memref<5x20x28xf32, #tpu.memory_space<vmem>>, vector<1x20x28xf32>
    %75 = vector.shape_cast %74 : vector<1x20x28xf32> to vector<20x28xf32>
    %cst_80 = arith.constant dense<0.000000e+00> : vector<20x84xf32>
    %76 = tpu.matmul %75, %64, %cst_80 {dimension_numbers = #tpu.dot_dimension_numbers<[1], [0], [0], [1], [0, 0, 1, 1], [], []>} : vector<20x28xf32>, vector<28x84xf32>, vector<20x84xf32> -> vector<20x84xf32>
    %c1_81 = arith.constant 1 : index
    %c0_82 = arith.constant 0 : index
    %c0_83 = arith.constant 0 : index
    %77 = vector.load %arg8[%c1_81, %c0_82, %c0_83] : memref<5x84x80xf32, #tpu.memory_space<vmem>>, vector<1x84x80xf32>
    %78 = vector.shape_cast %77 : vector<1x84x80xf32> to vector<84x80xf32>
    %cst_84 = arith.constant dense<0.000000e+00> : vector<20x80xf32>
    %79 = tpu.matmul %76, %78, %cst_84 {dimension_numbers = #tpu.dot_dimension_numbers<[1], [0], [0], [1], [0, 0, 1, 1], [], []>} : vector<20x84xf32>, vector<84x80xf32>, vector<20x80xf32> -> vector<20x80xf32>
    %80 = arith.addf %70, %79 : vector<20x80xf32>
    %c1_85 = arith.constant 1 : index
    %c0_86 = arith.constant 0 : index
    %c0_87 = arith.constant 0 : index
    %81 = vector.load %arg9[%c1_85, %c0_86, %c0_87] : memref<5x84x80xf32, #tpu.memory_space<vmem>>, vector<1x84x80xf32>
    %82 = vector.shape_cast %81 : vector<1x84x80xf32> to vector<84x80xf32>
    %cst_88 = arith.constant dense<0.000000e+00> : vector<20x80xf32>
    %83 = tpu.matmul %76, %82, %cst_88 {dimension_numbers = #tpu.dot_dimension_numbers<[1], [0], [0], [1], [0, 0, 1, 1], [], []>} : vector<20x84xf32>, vector<84x80xf32>, vector<20x80xf32> -> vector<20x80xf32>
    %84 = arith.addf %73, %83 : vector<20x80xf32>
    %c2_89 = arith.constant 2 : index
    %c0_90 = arith.constant 0 : index
    %c0_91 = arith.constant 0 : index
    %85 = vector.load %arg7[%c2_89, %c0_90, %c0_91] : memref<5x20x28xf32, #tpu.memory_space<vmem>>, vector<1x20x28xf32>
    %86 = vector.shape_cast %85 : vector<1x20x28xf32> to vector<20x28xf32>
    %cst_92 = arith.constant dense<0.000000e+00> : vector<20x84xf32>
    %87 = tpu.matmul %86, %64, %cst_92 {dimension_numbers = #tpu.dot_dimension_numbers<[1], [0], [0], [1], [0, 0, 1, 1], [], []>} : vector<20x28xf32>, vector<28x84xf32>, vector<20x84xf32> -> vector<20x84xf32>
    %c2_93 = arith.constant 2 : index
    %c0_94 = arith.constant 0 : index
    %c0_95 = arith.constant 0 : index
    %88 = vector.load %arg8[%c2_93, %c0_94, %c0_95] : memref<5x84x80xf32, #tpu.memory_space<vmem>>, vector<1x84x80xf32>
    %89 = vector.shape_cast %88 : vector<1x84x80xf32> to vector<84x80xf32>
    %cst_96 = arith.constant dense<0.000000e+00> : vector<20x80xf32>
    %90 = tpu.matmul %87, %89, %cst_96 {dimension_numbers = #tpu.dot_dimension_numbers<[1], [0], [0], [1], [0, 0, 1, 1], [], []>} : vector<20x84xf32>, vector<84x80xf32>, vector<20x80xf32> -> vector<20x80xf32>
    %91 = arith.addf %80, %90 : vector<20x80xf32>
    %c2_97 = arith.constant 2 : index
    %c0_98 = arith.constant 0 : index
    %c0_99 = arith.constant 0 : index
    %92 = vector.load %arg9[%c2_97, %c0_98, %c0_99] : memref<5x84x80xf32, #tpu.memory_space<vmem>>, vector<1x84x80xf32>
    %93 = vector.shape_cast %92 : vector<1x84x80xf32> to vector<84x80xf32>
    %cst_100 = arith.constant dense<0.000000e+00> : vector<20x80xf32>
    %94 = tpu.matmul %87, %93, %cst_100 {dimension_numbers = #tpu.dot_dimension_numbers<[1], [0], [0], [1], [0, 0, 1, 1], [], []>} : vector<20x84xf32>, vector<84x80xf32>, vector<20x80xf32> -> vector<20x80xf32>
    %95 = arith.addf %84, %94 : vector<20x80xf32>
    %c3_101 = arith.constant 3 : index
    %c0_102 = arith.constant 0 : index
    %c0_103 = arith.constant 0 : index
    %96 = vector.load %arg7[%c3_101, %c0_102, %c0_103] : memref<5x20x28xf32, #tpu.memory_space<vmem>>, vector<1x20x28xf32>
    %97 = vector.shape_cast %96 : vector<1x20x28xf32> to vector<20x28xf32>
    %cst_104 = arith.constant dense<0.000000e+00> : vector<20x84xf32>
    %98 = tpu.matmul %97, %64, %cst_104 {dimension_numbers = #tpu.dot_dimension_numbers<[1], [0], [0], [1], [0, 0, 1, 1], [], []>} : vector<20x28xf32>, vector<28x84xf32>, vector<20x84xf32> -> vector<20x84xf32>
    %c3_105 = arith.constant 3 : index
    %c0_106 = arith.constant 0 : index
    %c0_107 = arith.constant 0 : index
    %99 = vector.load %arg8[%c3_105, %c0_106, %c0_107] : memref<5x84x80xf32, #tpu.memory_space<vmem>>, vector<1x84x80xf32>
    %100 = vector.shape_cast %99 : vector<1x84x80xf32> to vector<84x80xf32>
    %cst_108 = arith.constant dense<0.000000e+00> : vector<20x80xf32>
    %101 = tpu.matmul %98, %100, %cst_108 {dimension_numbers = #tpu.dot_dimension_numbers<[1], [0], [0], [1], [0, 0, 1, 1], [], []>} : vector<20x84xf32>, vector<84x80xf32>, vector<20x80xf32> -> vector<20x80xf32>
    %102 = arith.addf %91, %101 : vector<20x80xf32>
    %c3_109 = arith.constant 3 : index
    %c0_110 = arith.constant 0 : index
    %c0_111 = arith.constant 0 : index
    %103 = vector.load %arg9[%c3_109, %c0_110, %c0_111] : memref<5x84x80xf32, #tpu.memory_space<vmem>>, vector<1x84x80xf32>
    %104 = vector.shape_cast %103 : vector<1x84x80xf32> to vector<84x80xf32>
    %cst_112 = arith.constant dense<0.000000e+00> : vector<20x80xf32>
    %105 = tpu.matmul %98, %104, %cst_112 {dimension_numbers = #tpu.dot_dimension_numbers<[1], [0], [0], [1], [0, 0, 1, 1], [], []>} : vector<20x84xf32>, vector<84x80xf32>, vector<20x80xf32> -> vector<20x80xf32>
    %106 = arith.addf %95, %105 : vector<20x80xf32>
    %c4_113 = arith.constant 4 : index
    %c0_114 = arith.constant 0 : index
    %c0_115 = arith.constant 0 : index
    %107 = vector.load %arg7[%c4_113, %c0_114, %c0_115] : memref<5x20x28xf32, #tpu.memory_space<vmem>>, vector<1x20x28xf32>
    %108 = vector.shape_cast %107 : vector<1x20x28xf32> to vector<20x28xf32>
    %cst_116 = arith.constant dense<0.000000e+00> : vector<20x84xf32>
    %109 = tpu.matmul %108, %64, %cst_116 {dimension_numbers = #tpu.dot_dimension_numbers<[1], [0], [0], [1], [0, 0, 1, 1], [], []>} : vector<20x28xf32>, vector<28x84xf32>, vector<20x84xf32> -> vector<20x84xf32>
    %c4_117 = arith.constant 4 : index
    %c0_118 = arith.constant 0 : index
    %c0_119 = arith.constant 0 : index
    %110 = vector.load %arg8[%c4_117, %c0_118, %c0_119] : memref<5x84x80xf32, #tpu.memory_space<vmem>>, vector<1x84x80xf32>
    %111 = vector.shape_cast %110 : vector<1x84x80xf32> to vector<84x80xf32>
    %cst_120 = arith.constant dense<0.000000e+00> : vector<20x80xf32>
    %112 = tpu.matmul %109, %111, %cst_120 {dimension_numbers = #tpu.dot_dimension_numbers<[1], [0], [0], [1], [0, 0, 1, 1], [], []>} : vector<20x84xf32>, vector<84x80xf32>, vector<20x80xf32> -> vector<20x80xf32>
    %113 = arith.addf %102, %112 : vector<20x80xf32>
    %c4_121 = arith.constant 4 : index
    %c0_122 = arith.constant 0 : index
    %c0_123 = arith.constant 0 : index
    %114 = vector.load %arg9[%c4_121, %c0_122, %c0_123] : memref<5x84x80xf32, #tpu.memory_space<vmem>>, vector<1x84x80xf32>
    %115 = vector.shape_cast %114 : vector<1x84x80xf32> to vector<84x80xf32>
    %cst_124 = arith.constant dense<0.000000e+00> : vector<20x80xf32>
    %116 = tpu.matmul %109, %115, %cst_124 {dimension_numbers = #tpu.dot_dimension_numbers<[1], [0], [0], [1], [0, 0, 1, 1], [], []>} : vector<20x84xf32>, vector<84x80xf32>, vector<20x80xf32> -> vector<20x80xf32>
    %117 = arith.addf %106, %116 : vector<20x80xf32>
    %118 = arith.maximumf %113, %117 : vector<20x80xf32>
    %c0_125 = arith.constant 0 : index
    %c0_126 = arith.constant 0 : index
    %119 = vector.load %arg10[%c0_125, %c0_126] : memref<1x80xf32, #tpu.memory_space<vmem>>, vector<1x80xf32>
    %120 = vector.broadcast %119 : vector<1x80xf32> to vector<20x80xf32>
    %121 = arith.addf %118, %120 : vector<20x80xf32>
    %cst_127 = arith.constant 0.000000e+00 : f32
    %122 = vector.broadcast %cst_127 : f32 to vector<20x80xf32>
    %123 = arith.maximumf %121, %122 : vector<20x80xf32>
    %c0_128 = arith.constant 0 : index
    %c0_129 = arith.constant 0 : index
    %124 = vector.load %arg11[%c0_128, %c0_129] : memref<10x20xf32, #tpu.memory_space<vmem>>, vector<10x20xf32>
    %cst_130 = arith.constant dense<0.000000e+00> : vector<10x80xf32>
    %125 = tpu.matmul %124, %123, %cst_130 {dimension_numbers = #tpu.dot_dimension_numbers<[1], [0], [0], [1], [0, 0, 1, 1], [], []>} : vector<10x20xf32>, vector<20x80xf32>, vector<10x80xf32> -> vector<10x80xf32>
    %c0_131 = arith.constant 0 : index
    %c0_132 = arith.constant 0 : index
    %126 = vector.load %arg12[%c0_131, %c0_132] : memref<10x20xf32, #tpu.memory_space<vmem>>, vector<10x20xf32>
    %cst_133 = arith.constant dense<0.000000e+00> : vector<10x80xf32>
    %127 = tpu.matmul %126, %123, %cst_133 {dimension_numbers = #tpu.dot_dimension_numbers<[1], [0], [0], [1], [0, 0, 1, 1], [], []>} : vector<10x20xf32>, vector<20x80xf32>, vector<10x80xf32> -> vector<10x80xf32>
    %128 = arith.maximumf %125, %127 : vector<10x80xf32>
    %c0_134 = arith.constant 0 : index
    %c0_135 = arith.constant 0 : index
    %c0_136 = arith.constant 0 : index
    %129 = vector.load %arg13[%c0_134, %c0_135, %c0_136] : memref<5x2x10xf32, #tpu.memory_space<vmem>>, vector<1x2x10xf32>
    %130 = vector.shape_cast %129 : vector<1x2x10xf32> to vector<2x10xf32>
    %cst_137 = arith.constant dense<0.000000e+00> : vector<2x80xf32>
    %131 = tpu.matmul %130, %128, %cst_137 {dimension_numbers = #tpu.dot_dimension_numbers<[1], [0], [0], [1], [0, 0, 1, 1], [], []>} : vector<2x10xf32>, vector<10x80xf32>, vector<2x80xf32> -> vector<2x80xf32>
    %c0_138 = arith.constant 0 : index
    %c0_139 = arith.constant 0 : index
    %c0_140 = arith.constant 0 : index
    %132 = vector.load %arg14[%c0_138, %c0_139, %c0_140] : memref<5x80x120xf32, #tpu.memory_space<vmem>>, vector<1x80x120xf32>
    %133 = vector.shape_cast %132 : vector<1x80x120xf32> to vector<80x120xf32>
    %cst_141 = arith.constant dense<0.000000e+00> : vector<2x120xf32>
    %134 = tpu.matmul %131, %133, %cst_141 {dimension_numbers = #tpu.dot_dimension_numbers<[1], [0], [0], [1], [0, 0, 1, 1], [], []>} : vector<2x80xf32>, vector<80x120xf32>, vector<2x120xf32> -> vector<2x120xf32>
    %c1_142 = arith.constant 1 : index
    %c0_143 = arith.constant 0 : index
    %c0_144 = arith.constant 0 : index
    %135 = vector.load %arg13[%c1_142, %c0_143, %c0_144] : memref<5x2x10xf32, #tpu.memory_space<vmem>>, vector<1x2x10xf32>
    %136 = vector.shape_cast %135 : vector<1x2x10xf32> to vector<2x10xf32>
    %cst_145 = arith.constant dense<0.000000e+00> : vector<2x80xf32>
    %137 = tpu.matmul %136, %128, %cst_145 {dimension_numbers = #tpu.dot_dimension_numbers<[1], [0], [0], [1], [0, 0, 1, 1], [], []>} : vector<2x10xf32>, vector<10x80xf32>, vector<2x80xf32> -> vector<2x80xf32>
    %c1_146 = arith.constant 1 : index
    %c0_147 = arith.constant 0 : index
    %c0_148 = arith.constant 0 : index
    %138 = vector.load %arg14[%c1_146, %c0_147, %c0_148] : memref<5x80x120xf32, #tpu.memory_space<vmem>>, vector<1x80x120xf32>
    %139 = vector.shape_cast %138 : vector<1x80x120xf32> to vector<80x120xf32>
    %cst_149 = arith.constant dense<0.000000e+00> : vector<2x120xf32>
    %140 = tpu.matmul %137, %139, %cst_149 {dimension_numbers = #tpu.dot_dimension_numbers<[1], [0], [0], [1], [0, 0, 1, 1], [], []>} : vector<2x80xf32>, vector<80x120xf32>, vector<2x120xf32> -> vector<2x120xf32>
    %141 = arith.addf %134, %140 : vector<2x120xf32>
    %c2_150 = arith.constant 2 : index
    %c0_151 = arith.constant 0 : index
    %c0_152 = arith.constant 0 : index
    %142 = vector.load %arg13[%c2_150, %c0_151, %c0_152] : memref<5x2x10xf32, #tpu.memory_space<vmem>>, vector<1x2x10xf32>
    %143 = vector.shape_cast %142 : vector<1x2x10xf32> to vector<2x10xf32>
    %cst_153 = arith.constant dense<0.000000e+00> : vector<2x80xf32>
    %144 = tpu.matmul %143, %128, %cst_153 {dimension_numbers = #tpu.dot_dimension_numbers<[1], [0], [0], [1], [0, 0, 1, 1], [], []>} : vector<2x10xf32>, vector<10x80xf32>, vector<2x80xf32> -> vector<2x80xf32>
    %c2_154 = arith.constant 2 : index
    %c0_155 = arith.constant 0 : index
    %c0_156 = arith.constant 0 : index
    %145 = vector.load %arg14[%c2_154, %c0_155, %c0_156] : memref<5x80x120xf32, #tpu.memory_space<vmem>>, vector<1x80x120xf32>
    %146 = vector.shape_cast %145 : vector<1x80x120xf32> to vector<80x120xf32>
    %cst_157 = arith.constant dense<0.000000e+00> : vector<2x120xf32>
    %147 = tpu.matmul %144, %146, %cst_157 {dimension_numbers = #tpu.dot_dimension_numbers<[1], [0], [0], [1], [0, 0, 1, 1], [], []>} : vector<2x80xf32>, vector<80x120xf32>, vector<2x120xf32> -> vector<2x120xf32>
    %148 = arith.addf %141, %147 : vector<2x120xf32>
    %c3_158 = arith.constant 3 : index
    %c0_159 = arith.constant 0 : index
    %c0_160 = arith.constant 0 : index
    %149 = vector.load %arg13[%c3_158, %c0_159, %c0_160] : memref<5x2x10xf32, #tpu.memory_space<vmem>>, vector<1x2x10xf32>
    %150 = vector.shape_cast %149 : vector<1x2x10xf32> to vector<2x10xf32>
    %cst_161 = arith.constant dense<0.000000e+00> : vector<2x80xf32>
    %151 = tpu.matmul %150, %128, %cst_161 {dimension_numbers = #tpu.dot_dimension_numbers<[1], [0], [0], [1], [0, 0, 1, 1], [], []>} : vector<2x10xf32>, vector<10x80xf32>, vector<2x80xf32> -> vector<2x80xf32>
    %c3_162 = arith.constant 3 : index
    %c0_163 = arith.constant 0 : index
    %c0_164 = arith.constant 0 : index
    %152 = vector.load %arg14[%c3_162, %c0_163, %c0_164] : memref<5x80x120xf32, #tpu.memory_space<vmem>>, vector<1x80x120xf32>
    %153 = vector.shape_cast %152 : vector<1x80x120xf32> to vector<80x120xf32>
    %cst_165 = arith.constant dense<0.000000e+00> : vector<2x120xf32>
    %154 = tpu.matmul %151, %153, %cst_165 {dimension_numbers = #tpu.dot_dimension_numbers<[1], [0], [0], [1], [0, 0, 1, 1], [], []>} : vector<2x80xf32>, vector<80x120xf32>, vector<2x120xf32> -> vector<2x120xf32>
    %155 = arith.addf %148, %154 : vector<2x120xf32>
    %c4_166 = arith.constant 4 : index
    %c0_167 = arith.constant 0 : index
    %c0_168 = arith.constant 0 : index
    %156 = vector.load %arg13[%c4_166, %c0_167, %c0_168] : memref<5x2x10xf32, #tpu.memory_space<vmem>>, vector<1x2x10xf32>
    %157 = vector.shape_cast %156 : vector<1x2x10xf32> to vector<2x10xf32>
    %cst_169 = arith.constant dense<0.000000e+00> : vector<2x80xf32>
    %158 = tpu.matmul %157, %128, %cst_169 {dimension_numbers = #tpu.dot_dimension_numbers<[1], [0], [0], [1], [0, 0, 1, 1], [], []>} : vector<2x10xf32>, vector<10x80xf32>, vector<2x80xf32> -> vector<2x80xf32>
    %c4_170 = arith.constant 4 : index
    %c0_171 = arith.constant 0 : index
    %c0_172 = arith.constant 0 : index
    %159 = vector.load %arg14[%c4_170, %c0_171, %c0_172] : memref<5x80x120xf32, #tpu.memory_space<vmem>>, vector<1x80x120xf32>
    %160 = vector.shape_cast %159 : vector<1x80x120xf32> to vector<80x120xf32>
    %cst_173 = arith.constant dense<0.000000e+00> : vector<2x120xf32>
    %161 = tpu.matmul %158, %160, %cst_173 {dimension_numbers = #tpu.dot_dimension_numbers<[1], [0], [0], [1], [0, 0, 1, 1], [], []>} : vector<2x80xf32>, vector<80x120xf32>, vector<2x120xf32> -> vector<2x120xf32>
    %162 = arith.addf %155, %161 : vector<2x120xf32>
    %c0_174 = arith.constant 0 : index
    %c0_175 = arith.constant 0 : index
    %163 = vector.load %arg15[%c0_174, %c0_175] : memref<1x120xf32, #tpu.memory_space<vmem>>, vector<1x120xf32>
    %164 = vector.broadcast %163 : vector<1x120xf32> to vector<2x120xf32>
    %165 = arith.addf %162, %164 : vector<2x120xf32>
    %cst_176 = arith.constant 0.000000e+00 : f32
    %166 = vector.broadcast %cst_176 : f32 to vector<2x120xf32>
    %167 = arith.maximumf %165, %166 : vector<2x120xf32>
    %c0_177 = arith.constant 0 : index
    %c0_178 = arith.constant 0 : index
    %168 = vector.load %arg16[%c0_177, %c0_178] : memref<120x84xf32, #tpu.memory_space<vmem>>, vector<120x84xf32>
    %cst_179 = arith.constant dense<0.000000e+00> : vector<2x84xf32>
    %169 = tpu.matmul %167, %168, %cst_179 {dimension_numbers = #tpu.dot_dimension_numbers<[1], [0], [0], [1], [0, 0, 1, 1], [], []>} : vector<2x120xf32>, vector<120x84xf32>, vector<2x84xf32> -> vector<2x84xf32>
    %c0_180 = arith.constant 0 : index
    %c0_181 = arith.constant 0 : index
    %170 = vector.load %arg17[%c0_180, %c0_181] : memref<1x84xf32, #tpu.memory_space<vmem>>, vector<1x84xf32>
    %171 = vector.broadcast %170 : vector<1x84xf32> to vector<2x84xf32>
    %172 = arith.addf %169, %171 : vector<2x84xf32>
    %cst_182 = arith.constant 0.000000e+00 : f32
    %173 = vector.broadcast %cst_182 : f32 to vector<2x84xf32>
    %174 = arith.maximumf %172, %173 : vector<2x84xf32>
    %c0_183 = arith.constant 0 : index
    %c0_184 = arith.constant 0 : index
    %175 = vector.load %arg18[%c0_183, %c0_184] : memref<84x10xf32, #tpu.memory_space<vmem>>, vector<84x10xf32>
    %cst_185 = arith.constant dense<0.000000e+00> : vector<2x10xf32>
    %176 = tpu.matmul %174, %175, %cst_185 {dimension_numbers = #tpu.dot_dimension_numbers<[1], [0], [0], [1], [0, 0, 1, 1], [], []>} : vector<2x84xf32>, vector<84x10xf32>, vector<2x10xf32> -> vector<2x10xf32>
    %c0_186 = arith.constant 0 : index
    %c0_187 = arith.constant 0 : index
    %177 = vector.load %arg19[%c0_186, %c0_187] : memref<1x10xf32, #tpu.memory_space<vmem>>, vector<1x10xf32>
    %178 = vector.broadcast %177 : vector<1x10xf32> to vector<2x10xf32>
    %179 = arith.addf %176, %178 : vector<2x10xf32>
    %c0_188 = arith.constant 0 : index
    %c0_189 = arith.constant 0 : index
    %180 = vector.load %arg20[%c0_188, %c0_189] : memref<2x10xf32, #tpu.memory_space<vmem>>, vector<2x10xf32>
    tpu.vector_store %arg20[%c0_188, %c0_189], %179 {strides = array<i32>} : memref<2x10xf32, #tpu.memory_space<vmem>>, vector<2x10xf32>,
    return
  }
}

</mosaic_0001>

<bundles_post_ra>
// kernel: net_pallas.1
= control target key start
LH: loop header
LB: loop body
LE: loop exit
PB: predicated region body
PF: predicated region fallthrough
CT: control target
= control target key end

     0   :  { %s9339_s0 = inlined_call_operand.vmem [shape: f32[64,32], index: 0, kind: input, shape index: {}]   ;;  %s9340_s1 = inlined_call_operand.vmem [shape: f32[5,56,64], index: 1, kind: input, shape index: {}]   ;;  %s9341_s2 = inlined_call_operand.vmem [shape: f32[5,32,84], index: 2, kind: input, shape index: {}]   ;;  %s9342_s3 = inlined_call_operand.vmem [shape: f32[5,32,84], index: 3, kind: input, shape index: {}]   ;;  %s9343_s4 = inlined_call_operand.vmem [shape: f32[1,84], index: 4, kind: input, shape index: {}]   ;;  %s9344_s5 = inlined_call_operand.vmem [shape: f32[28,56], index: 5, kind: input, shape index: {}]   ;;  %s9345_s6 = inlined_call_operand.vmem [shape: f32[28,56], index: 6, kind: input, shape index: {}]   ;;  %s9346_s7 = inlined_call_operand.vmem [shape: f32[5,20,28], index: 7, kind: input, shape index: {}]   ;;  %s9347_s8 = inlined_call_operand.vmem [shape: f32[5,84,80], index: 8, kind: input, shape index: {}]   ;;  %s9348_s9 = inlined_call_operand.vmem [shape: f32[5,84,80], index: 9, kind: input, shape index: {}]   ;;  %s9349_s10 = inlined_call_operand.vmem [shape: f32[1,80], index: 10, kind: input, shape index: {}]   ;;  %s9350_s11 = inlined_call_operand.vmem [shape: f32[10,20], index: 11, kind: input, shape index: {}]   ;;  %s9351_s12 = inlined_call_operand.vmem [shape: f32[10,20], index: 12, kind: input, shape index: {}]   ;;  %s9352_s13 = inlined_call_operand.vmem [shape: f32[5,2,10], index: 13, kind: input, shape index: {}]   ;;  %s9353_s14 = inlined_call_operand.vmem [shape: f32[5,80,120], index: 14, kind: input, shape index: {}]   ;;  %s9354_s15 = inlined_call_operand.vmem [shape: f32[1,120], index: 15, kind: input, shape index: {}]   ;;  %s9355_s16 = inlined_call_operand.vmem [shape: f32[120,84], index: 16, kind: input, shape index: {}]   ;;  %s9356_s17 = inlined_call_operand.vmem [shape: f32[1,84], index: 17, kind: input, shape index: {}]   ;;  %s9357_s18 = inlined_call_operand.vmem [shape: f32[84,10], index: 18, kind: input, shape index: {}]   ;;  %s9358_s19 = inlined_call_operand.vmem [shape: f32[1,10], index: 19, kind: input, shape index: {}]   ;;  %s9359_s20 = inlined_call_operand.hbm [shape: f32[2,10], index: 20, kind: output, shape index: {}]  }
   0x1   :  { %9364 = sst [smem:[#allocation5_spill]] %s9339_s0 }
   0x2   :  { %9365 = sst [smem:[#allocation6_spill]] %s9340_s1 }
   0x3   :  { %9366 = sst [smem:[#allocation7_spill]] %s9341_s2 }
   0x4   :  { %9367 = sst [smem:[#allocation8_spill]] %s9342_s3 }
   0x5   :  { %9368 = sst [smem:[#allocation9_spill]] %s9343_s4 }
   0x6   :  { %s9369_s23 = sld [smem:[#allocation5_spill]]  ;;  %v7526_v3 = vmov 0.0|0.0   ;;  %vm7527_vm0 = vmmov 0   ;;  %v7528_v6 = vmov 0.0  }
   0x7   :  { %6881 = vmatprep.subr.bf16.mxu1 %v7526_v3  ;;  %5786 = vmatprep.mubr.msk.f32.mxu1 %vm7527_vm0, %v7528_v6 }
   0x8   :  { %6869 = vmatprep.subr.bf16.mxu0 %v7526_v3  ;;  %5749 = vmatprep.mubr.msk.f32.mxu0 %vm7527_vm0, %v7528_v6 }
   0xc   :  { %v66_v0 = vld [vmem:[%s9369_s23] sm:$0xff]  ;;  %v67_v1 = vld [vmem:[%s9369_s23 + $0x8] sm:$0xff]  ;;  %v68_v2 = vld [vmem:[%s9369_s23 + $0x10] sm:$0xff] }
   0xd   :  { %v7646_v4 = vpack.c.bf16 %v67_v1, %v66_v0  ;;  %v69_v5 = vld [vmem:[%s9369_s23 + $0x18] sm:$0xff]  ;;  %v70_v8 = vld [vmem:[%s9369_s23 + $0x20] sm:$0xff]  ;;  %v71_v9 = vld [vmem:[%s9369_s23 + $0x28] sm:$0xff] }
   0xe   :  { %v7657_v7 = vpack.c.bf16 %v69_v5, %v68_v2  ;;  %v7669_v10 = vpack.c.bf16 %v71_v9, %v70_v8  ;;  %v72_v11 = vld [vmem:[%s9369_s23 + $0x30] sm:$0xff]  ;;  %v73_v12 = vld [vmem:[%s9369_s23 + $0x38] sm:$0xff] }
   0xf   :  { %6883 = vmatpush3.bf16.msra.mxu1 %v7646_v4  ;;  %6871 = vmatpush3.bf16.msra.mxu0 %v7646_v4 }
  0x10   :  { %6884 = vmatprep.subr.bf16.mxu1 %v7526_v3  ;;  %6872 = vmatprep.subr.bf16.mxu0 %v7526_v3 }
  0x13   :  { %6886 = vmatpush3.bf16.msra.mxu1 %v7657_v7  ;;  %6874 = vmatpush3.bf16.msra.mxu0 %v7657_v7 }
  0x14   :  { %6887 = vmatprep.subr.bf16.mxu1 %v7526_v3  ;;  %6875 = vmatprep.subr.bf16.mxu0 %v7526_v3 }
  0x15   :  { %25 = vsyncpa [#allocation3], 0  ;;  %v7681_v13 = vpack.c.bf16 %v73_v12, %v72_v11  ;;  %s9370_s25 = sld [smem:[#allocation7_spill]]  ;;  %s9371_s28 = sld [smem:[#allocation8_spill]]  ;;  %vm81_vm1 = vcmask 523264   ;;  %vm345_vm2 = vcmask 261120  }
  0x16   :  { %s9372_s21 = sld [smem:[#allocation6_spill]]  ;;  %vm1947_vm3 = vcmask 457728   ;;  %s9373_s4 = sld [smem:[#allocation9_spill]]  ;;  %vm2163_vm4 = vcmask 1043456   ;;  %vm7529_vm5 = vmmov 1   ;;  %vm2153_vm7 = vcmask 228352  }
  0x17   :  { %6889 = vmatpush3.bf16.msra.mxu1 %v7669_v10  ;;  %6877 = vmatpush3.bf16.msra.mxu0 %v7669_v10  ;;  %vm8329_vm6 = vmpackc.low %vm2163_vm4, %vm7529_vm5  ;;  %vm2374_vm8 = vcmask 687104   ;;  %vm3649_vm9 = vcmask 162816   ;;  %vm3824_vm10 = vcmask 1041408   ;;  %vm3820_vm12 = vcmask 80896  }
  0x18   :  { %6890 = vmatprep.subr.bf16.mxu1 %v7526_v3  ;;  %6878 = vmatprep.subr.bf16.mxu0 %v7526_v3  ;;  %vm8977_vm11 = vmpackc.low %vm3824_vm10, %vm7529_vm5  ;;  %vm3994_vm13 = vcmask 654336   ;;  %vm4652_vm14 = vcmask 982016   ;;  %vm4821_vm15 = vcmask 74752  }
  0x1b   :  { %v4858_v14 = vld [vmem:[%s9370_s25 + $0x20] sm:$0xff]  ;;  %v4859_v15 = vld [vmem:[%s9370_s25 + $0x28] sm:$0xff]  ;;  %6892 = vmatpush3.bf16.msra.mxu1 %v7681_v13  ;;  %6880 = vmatpush3.bf16.msra.mxu0 %v7681_v13  ;;  %v4860_v22 = vld [vmem:[%s9370_s25 + $0x30] sm:$0xff] }
  0x1c   :  { %v4876_v16 = vld [vmem:[%s9371_s28 + $0x20] sm:$0xff]  ;;  %v4877_v17 = vld [vmem:[%s9371_s28 + $0x28] sm:$0xff]  ;;  %v4844_v18 = vld [vmem:[%s9372_s21 + $0x38] sm:$0xff]  ;;  %6893 = vmatprep.subr.bf16.mxu0 %v7526_v3  ;;  %6905 = vmatprep.subr.bf16.mxu1 %v7526_v3  ;;  %v6894_v20 = vpack.c.bf16 %v4859_v15, %v4858_v14 }
  0x1d   :  { %v74_v19 = vld [vmem:[%s9372_s21] sm:$0xff]  ;;  %v6906_v21 = vpack.c.bf16 %v4877_v17, %v4876_v16  ;;  %v4861_v23 = vld [vmem:[%s9370_s25 + $0x38] sm:$0xff]  ;;  %v4878_v24 = vld [vmem:[%s9371_s28 + $0x30] sm:$0xff] }
  0x1e   :  { %v4879_v25 = vld [vmem:[%s9371_s28 + $0x38] sm:$0xff]  ;;  %5787 = vmatmul.mubr.msk.f32.vlgmr.msra.gmra.mrb[0].mxu1 %vm81_vm1, %v4844_v18  ;;  %5750 = vmatmul.mubr.msk.f32.vlgmr.msra.gmra.mrb[0].mxu0 %vm81_vm1, %v74_v19  ;;  %v4845_v26 = vld [vmem:[%s9372_s21 + $0x40] sm:$0xff]  ;;  %v75_v27 = vld [vmem:[%s9372_s21 + $0x8] sm:$0xff]  ;;  %v6897_v28 = vpack.c.bf16 %v4861_v23, %v4860_v22 }
  0x1f   :  { %5789 = vmatprep.mubr.msk.f32.mxu1 %vm7527_vm0, %v7528_v6  ;;  %5752 = vmatprep.mubr.msk.f32.mxu0 %vm7527_vm0, %v7528_v6  ;;  %v6909_v29 = vpack.c.bf16 %v4879_v25, %v4878_v24  ;;  %v4846_v30 = vld [vmem:[%s9372_s21 + $0x48] sm:$0xff]  ;;  %v76_v31 = vld [vmem:[%s9372_s21 + $0x10] sm:$0xff]  ;;  %v77_v33 = vld [vmem:[%s9372_s21 + $0x18] sm:$0xff] }
  0x20   :  { %6895 = vmatpush3.bf16.msra.mxu0 %v6894_v20  ;;  %6907 = vmatpush3.bf16.msra.mxu1 %v6906_v21  ;;  %v4847_v32 = vld [vmem:[%s9372_s21 + $0x50] sm:$0xff]  ;;  %v4848_v34 = vld [vmem:[%s9372_s21 + $0x58] sm:$0xff]  ;;  %v78_v35 = vld [vmem:[%s9372_s21 + $0x20] sm:$0xff] }
  0x21   :  { %6896 = vmatprep.subr.bf16.mxu0 %v7526_v3  ;;  %6908 = vmatprep.subr.bf16.mxu1 %v7526_v3  ;;  %v4849_v36 = vld [vmem:[%s9372_s21 + $0x60] sm:$0xff]  ;;  %v79_v37 = vld [vmem:[%s9372_s21 + $0x28] sm:$0xff]  ;;  %v80_v39 = vld [vmem:[%s9372_s21 + $0x30] sm:$0xff] }
  0x22   :  { %5790 = vmatmul.mubr.msk.f32.gmra.mrb[2].mxu1 %vm81_vm1, %v4845_v26  ;;  %5753 = vmatmul.mubr.msk.f32.gmra.mrb[2].mxu0 %vm81_vm1, %v75_v27  ;;  %v4850_v38 = vld [vmem:[%s9372_s21 + $0x68] sm:$0xff]  ;;  %v203_v40 = vld [vmem:[%s9370_s25] sm:$0xff]  ;;  %v205_v46 = vld [vmem:[%s9370_s25 + $0x10] sm:$0xff] }
  0x23   :  { %5792 = vmatprep.mubr.msk.f32.mxu1 %vm7527_vm0, %v7528_v6  ;;  %5755 = vmatprep.mubr.msk.f32.mxu0 %vm7527_vm0, %v7528_v6  ;;  %v204_v41 = vld [vmem:[%s9370_s25 + $0x8] sm:$0xff]  ;;  %v207_v42 = vld [vmem:[%s9371_s28] sm:$0xff]  ;;  %v206_v48 = vld [vmem:[%s9370_s25 + $0x18] sm:$0xff] }
  0x24   :  { %6898 = vmatpush3.bf16.msra.mxu0 %v6897_v28  ;;  %6910 = vmatpush3.bf16.msra.mxu1 %v6909_v29  ;;  %v208_v43 = vld [vmem:[%s9371_s28 + $0x8] sm:$0xff]  ;;  %v6900_v44 = vpack.c.bf16 %v204_v41, %v203_v40  ;;  %v209_v49 = vld [vmem:[%s9371_s28 + $0x10] sm:$0xff]  ;;  %v210_v50 = vld [vmem:[%s9371_s28 + $0x18] sm:$0xff]  ;;  %v6903_v54 = vpack.c.bf16 %v206_v48, %v205_v46 }
  0x25   :  { %6899 = vmatprep.subr.bf16.mxu0 %v7526_v3  ;;  %6911 = vmatprep.subr.bf16.mxu1 %v7526_v3  ;;  %v6912_v45 = vpack.c.bf16 %v208_v43, %v207_v42  ;;  %v6915_v55 = vpack.c.bf16 %v210_v50, %v209_v49  ;;  %v4919_v20 = vld [vmem:[%s9371_s28 + $0x40] sm:$0xff]  ;;  %v4920_v21 = vld [vmem:[%s9371_s28 + $0x48] sm:$0xff]  ;;  %v4921_v25 = vld [vmem:[%s9371_s28 + $0x50] sm:$0xff] }
  0x26   :  { %5793 = vmatmul.mubr.msk.f32.gmra.mrb[4].mxu1 %vm81_vm1, %v4846_v30  ;;  %5756 = vmatmul.mubr.msk.f32.gmra.mrb[4].mxu0 %vm81_vm1, %v76_v31  ;;  %v6936_v24 = vpack.c.bf16 %v4920_v21, %v4919_v20  ;;  %v4922_v26 = vld [vmem:[%s9371_s28 + $0x58] sm:$0xff]  ;;  %v4908_v28 = vld [vmem:[%s9370_s25 + $0x40] sm:$0xff]  ;;  %v4909_v29 = vld [vmem:[%s9370_s25 + $0x48] sm:$0xff] }
  0x27   :  { %5795 = vmatprep.mubr.msk.f32.mxu1 %vm7527_vm0, %v7528_v6  ;;  %5758 = vmatprep.mubr.msk.f32.mxu0 %vm7527_vm0, %v7528_v6  ;;  %v6939_v27 = vpack.c.bf16 %v4922_v26, %v4921_v25  ;;  %v4894_v30 = vld [vmem:[%s9372_s21 + $0x70] sm:$0xff]  ;;  %v6930_v31 = vpack.c.bf16 %v4909_v29, %v4908_v28  ;;  %v4900_v40 = vld [vmem:[%s9372_s21 + $0xa0] sm:$0xff]  ;;  %v4945_v42 = vld [vmem:[%s9370_s25 + $0x68] sm:$0xff] }
  0x28   :  { %v4944_v41 = vld [vmem:[%s9370_s25 + $0x60] sm:$0xff]  ;;  %v4947_v46 = vld [vmem:[%s9370_s25 + $0x78] sm:$0xff]  ;;  %v4993_v20 = vld [vmem:[%s9371_s28 + $0x90] sm:$0xff] }
  0x29   :  { %v6954_v43 = vpack.c.bf16 %v4945_v42, %v4944_v41  ;;  %v4994_v21 = vld [vmem:[%s9371_s28 + $0x98] sm:$0xff]  ;;  %v4970_v42 = vld [vmem:[%s9372_s21 + $0x100] sm:$0xff] }
  0x2a   :  { %5796 = vmatmul.mubr.msk.f32.gmra.mrb[6].mxu1 %vm81_vm1, %v4847_v32  ;;  %5759 = vmatmul.mubr.msk.f32.gmra.mrb[6].mxu0 %vm81_vm1, %v77_v33  ;;  %v4910_v32 = vld [vmem:[%s9370_s25 + $0x50] sm:$0xff]  ;;  %v4911_v33 = vld [vmem:[%s9370_s25 + $0x58] sm:$0xff] }
  0x2b   :  { %5798 = vmatprep.mubr.msk.f32.mxu1 %vm7527_vm0, %v7528_v6  ;;  %5761 = vmatprep.mubr.msk.f32.mxu0 %vm7527_vm0, %v7528_v6  ;;  %v4969_v41 = vld [vmem:[%s9372_s21 + $0xf8] sm:$0xff] }
  0x2e   :  { %5799 = vmatmul.mubr.msk.f32.gmra.mrb[8].mxu1 %vm81_vm1, %v4848_v34  ;;  %5762 = vmatmul.mubr.msk.f32.gmra.mrb[8].mxu0 %vm81_vm1, %v78_v35  ;;  %v4895_v34 = vld [vmem:[%s9372_s21 + $0x78] sm:$0xff]  ;;  %v6933_v35 = vpack.c.bf16 %v4911_v33, %v4910_v32 }
  0x2f   :  { %5801 = vmatprep.mubr.msk.f32.mxu1 %vm7527_vm0, %v7528_v6  ;;  %5764 = vmatprep.mubr.msk.f32.mxu0 %vm7527_vm0, %v7528_v6 }
  0x32   :  { %5802 = vmatmul.mubr.msk.f32.gmra.mrb[10].mxu1 %vm81_vm1, %v4849_v36  ;;  %5765 = vmatmul.mubr.msk.f32.gmra.mrb[10].mxu0 %vm81_vm1, %v79_v37  ;;  %v4896_v36 = vld [vmem:[%s9372_s21 + $0x80] sm:$0xff]  ;;  %v4897_v37 = vld [vmem:[%s9372_s21 + $0x88] sm:$0xff] }
  0x33   :  { %5804 = vmatprep.mubr.msk.f32.mxu1 %vm7527_vm0, %v7528_v6  ;;  %5767 = vmatprep.mubr.msk.f32.mxu0 %vm7527_vm0, %v7528_v6 }
  0x36   :  { %5805 = vmatmul.mubr.msk.f32.gmra.mrb[12].mxu1 %vm81_vm1, %v4850_v38  ;;  %5768 = vmatmul.mubr.msk.f32.gmra.mrb[12].mxu0 %vm81_vm1, %v80_v39  ;;  %v4898_v38 = vld [vmem:[%s9372_s21 + $0x90] sm:$0xff]  ;;  %v4899_v39 = vld [vmem:[%s9372_s21 + $0x98] sm:$0xff] }
  0x37   :  { %5815 = vmatprep.mubr.msk.f32.mxu0 %vm7527_vm0, %v7528_v6  ;;  %5873 = vmatprep.mubr.msk.f32.mxu1 %vm7527_vm0, %v7528_v6 }
  0xf1   :  { %v306_v47 = vpop.f32.mrb[0].mxu1  ;;  %v7826_v51 = vpop.f32.mrb[0].mxu0 }
  0xf2   :  { %v5788_v52 = vpop.f32.mrb[1].mxu1  ;;  %5816 = vmatmul.mubr.msk.f32.vlgmr.msra.gmra.mrb[14].mxu0 %vm345_vm2, %v306_v47  ;;  %5874 = vmatmul.mubr.msk.f32.vlgmr.msra.gmra.mrb[14].mxu1 %vm345_vm2, %v306_v47  ;;  %v5751_v53 = vpop.f32.mrb[1].mxu0 }
  0xf3   :  { %5818 = vmatprep.mubr.msk.f32.mxu0 %vm7527_vm0, %v7528_v6  ;;  %5876 = vmatprep.mubr.msk.f32.mxu1 %vm7527_vm0, %v7528_v6 }
  0xf4   :  { %6901 = vmatpush3.bf16.msra.mxu0 %v6900_v44  ;;  %6913 = vmatpush3.bf16.msra.mxu1 %v6912_v45  ;;  %v4946_v45 = vld [vmem:[%s9370_s25 + $0x70] sm:$0xff] }
  0xf5   :  { %v311_v56 = vpop.f32.mrb[2].mxu1  ;;  %6902 = vmatprep.subr.bf16.mxu0 %v7526_v3  ;;  %6914 = vmatprep.subr.bf16.mxu1 %v7526_v3  ;;  %v7836_v57 = vpop.f32.mrb[2].mxu0  ;;  %v6957_v48 = vpack.c.bf16 %v4947_v46, %v4946_v45 }
  0xf6   :  { %v5791_v58 = vpop.f32.mrb[3].mxu1  ;;  %5819 = vmatmul.mubr.msk.f32.gmra.mrb[16].mxu0 %vm345_vm2, %v311_v56  ;;  %5877 = vmatmul.mubr.msk.f32.gmra.mrb[16].mxu1 %vm345_vm2, %v311_v56  ;;  %v5754_v59 = vpop.f32.mrb[3].mxu0 }
  0xf7   :  { %5821 = vmatprep.mubr.msk.f32.mxu0 %vm7527_vm0, %v7528_v6  ;;  %5879 = vmatprep.mubr.msk.f32.mxu1 %vm7527_vm0, %v7528_v6  ;;  %v4955_v59 = vld [vmem:[%s9371_s28 + $0x60] sm:$0xff] }
  0xf8   :  { %6904 = vmatpush3.bf16.msra.mxu0 %v6903_v54  ;;  %6916 = vmatpush3.bf16.msra.mxu1 %v6915_v55 }
  0xf9   :  { %v316_v60 = vpop.f32.mrb[4].mxu1  ;;  %v7844_v61 = vpop.f32.mrb[4].mxu0  ;;  %6917 = vmatprep.subr.bf16.mxu0 %v7526_v3  ;;  %6935 = vmatprep.subr.bf16.mxu1 %v7526_v3 }
  0xfa   :  { %v5794_v62 = vpop.f32.mrb[5].mxu1  ;;  %5822 = vmatmul.mubr.msk.f32.gmra.mrb[18].mxu0 %vm345_vm2, %v316_v60  ;;  %5880 = vmatmul.mubr.msk.f32.gmra.mrb[18].mxu1 %vm345_vm2, %v316_v60  ;;  %v5757_v63 = vpop.f32.mrb[5].mxu0  ;;  %v4956_v60 = vld [vmem:[%s9371_s28 + $0x68] sm:$0xff] }
  0xfb   :  { %5824 = vmatprep.mubr.msk.f32.mxu0 %vm7527_vm0, %v7528_v6  ;;  %5882 = vmatprep.mubr.msk.f32.mxu1 %vm7527_vm0, %v7528_v6  ;;  %v4930_v63 = vld [vmem:[%s9372_s21 + $0xa8] sm:$0xff] }
  0xfd   :  { %v321_v0 = vpop.f32.mrb[6].mxu1  ;;  %v184_v1 = vpop.f32.mrb[6].mxu0 }
  0xfe   :  { %v5797_v2 = vpop.f32.mrb[7].mxu1  ;;  %5825 = vmatmul.mubr.msk.f32.gmra.mrb[20].mxu0 %vm345_vm2, %v321_v0  ;;  %5883 = vmatmul.mubr.msk.f32.gmra.mrb[20].mxu1 %vm345_vm2, %v321_v0  ;;  %v5760_v5 = vpop.f32.mrb[7].mxu0  ;;  %v6960_v0 = vpack.c.bf16 %v4956_v60, %v4955_v59  ;;  %v1943_v59 = vld [vmem:[%s9344_s5] sm:$0xff] }
  0xff   :  { %5827 = vmatprep.mubr.msk.f32.mxu0 %vm7527_vm0, %v7528_v6  ;;  %5885 = vmatprep.mubr.msk.f32.mxu1 %vm7527_vm0, %v7528_v6  ;;  %v4958_v2 = vld [vmem:[%s9371_s28 + $0x78] sm:$0xff]  ;;  %v4931_v5 = vld [vmem:[%s9372_s21 + $0xb0] sm:$0xff] }
 0x101   :  { %v326_v8 = vpop.f32.mrb[8].mxu1  ;;  %v189_v9 = vpop.f32.mrb[8].mxu0 }
 0x102   :  { %v5800_v11 = vpop.f32.mrb[9].mxu1  ;;  %5828 = vmatmul.mubr.msk.f32.gmra.mrb[22].mxu0 %vm345_vm2, %v326_v8  ;;  %5886 = vmatmul.mubr.msk.f32.gmra.mrb[22].mxu1 %vm345_vm2, %v326_v8  ;;  %v5763_v12 = vpop.f32.mrb[9].mxu0 }
 0x103   :  { %5830 = vmatprep.mubr.msk.f32.mxu0 %vm7527_vm0, %v7528_v6  ;;  %5888 = vmatprep.mubr.msk.f32.mxu1 %vm7527_vm0, %v7528_v6  ;;  %v4933_v11 = vld [vmem:[%s9372_s21 + $0xc0] sm:$0xff]  ;;  %v4934_v12 = vld [vmem:[%s9372_s21 + $0xc8] sm:$0xff] }
 0x105   :  { %v331_v14 = vpop.f32.mrb[10].mxu1  ;;  %v194_v15 = vpop.f32.mrb[10].mxu0 }
 0x106   :  { %v5803_v16 = vpop.f32.mrb[11].mxu1  ;;  %5831 = vmatmul.mubr.msk.f32.gmra.mrb[24].mxu0 %vm345_vm2, %v331_v14  ;;  %5889 = vmatmul.mubr.msk.f32.gmra.mrb[24].mxu1 %vm345_vm2, %v331_v14  ;;  %v5766_v17 = vpop.f32.mrb[11].mxu0  ;;  %v4935_v14 = vld [vmem:[%s9372_s21 + $0xd0] sm:$0xff] }
 0x107   :  { %5833 = vmatprep.mubr.msk.f32.mxu0 %vm7527_vm0, %v7528_v6  ;;  %5891 = vmatprep.mubr.msk.f32.mxu1 %vm7527_vm0, %v7528_v6  ;;  %v4991_v16 = vld [vmem:[%s9371_s28 + $0x80] sm:$0xff]  ;;  %v4992_v17 = vld [vmem:[%s9371_s28 + $0x88] sm:$0xff] }
 0x109   :  { %v336_v18 = vpop.f32.mrb[12].mxu1  ;;  %v199_v19 = vpop.f32.mrb[12].mxu0 }
 0x10a   :  { %v5806_v22 = vpop.f32.mrb[13].mxu1  ;;  %5834 = vmatmul.mubr.msk.f32.gmra.mrb[26].mxu0 %vm345_vm2, %v336_v18  ;;  %5892 = vmatmul.mubr.msk.f32.gmra.mrb[26].mxu1 %vm345_vm2, %v336_v18  ;;  %v5769_v23 = vpop.f32.mrb[13].mxu0  ;;  %v6984_v18 = vpack.c.bf16 %v4992_v17, %v4991_v16 }
 0x10b   :  { %5844 = vmatprep.mubr.msk.f32.mxu0 %vm7527_vm0, %v7528_v6  ;;  %5902 = vmatprep.mubr.msk.f32.mxu1 %vm7527_vm0, %v7528_v6  ;;  %v6987_v23 = vpack.c.bf16 %v4994_v21, %v4993_v20 }
 0x10e   :  { %5845 = vmatmul.mubr.msk.f32.vlgmr.msra.gmra.mrb[14].mxu0 %vm345_vm2, %v7826_v51  ;;  %5903 = vmatmul.mubr.msk.f32.vlgmr.msra.gmra.mrb[14].mxu1 %vm345_vm2, %v7826_v51 }
 0x10f   :  { %5847 = vmatprep.mubr.msk.f32.mxu0 %vm7527_vm0, %v7528_v6  ;;  %5905 = vmatprep.mubr.msk.f32.mxu1 %vm7527_vm0, %v7528_v6 }
 0x110   :  { %6919 = vmatpush3.bf16.msra.mxu0 %v7646_v4  ;;  %6937 = vmatpush3.bf16.msra.mxu1 %v6936_v24 }
 0x111   :  { %6920 = vmatprep.subr.bf16.mxu0 %v7526_v3  ;;  %6938 = vmatprep.subr.bf16.mxu1 %v7526_v3 }
 0x112   :  { %5848 = vmatmul.mubr.msk.f32.gmra.mrb[16].mxu0 %vm345_vm2, %v7836_v57  ;;  %5906 = vmatmul.mubr.msk.f32.gmra.mrb[16].mxu1 %vm345_vm2, %v7836_v57 }
 0x113   :  { %5850 = vmatprep.mubr.msk.f32.mxu0 %vm7527_vm0, %v7528_v6  ;;  %5908 = vmatprep.mubr.msk.f32.mxu1 %vm7527_vm0, %v7528_v6 }
 0x114   :  { %6922 = vmatpush3.bf16.msra.mxu0 %v7657_v7  ;;  %6940 = vmatpush3.bf16.msra.mxu1 %v6939_v27 }
 0x115   :  { %6923 = vmatprep.subr.bf16.mxu0 %v7526_v3  ;;  %6941 = vmatprep.subr.bf16.mxu1 %v7526_v3 }
 0x116   :  { %5851 = vmatmul.mubr.msk.f32.gmra.mrb[18].mxu0 %vm345_vm2, %v7844_v61  ;;  %5909 = vmatmul.mubr.msk.f32.gmra.mrb[18].mxu1 %vm345_vm2, %v7844_v61 }
 0x117   :  { %5853 = vmatprep.mubr.msk.f32.mxu0 %vm7527_vm0, %v7528_v6  ;;  %5911 = vmatprep.mubr.msk.f32.mxu1 %vm7527_vm0, %v7528_v6 }
 0x118   :  { %6925 = vmatpush3.bf16.msra.mxu0 %v7669_v10 }
 0x119   :  { %6926 = vmatprep.subr.bf16.mxu0 %v7526_v3 }
 0x11a   :  { %5854 = vmatmul.mubr.msk.f32.gmra.mrb[20].mxu0 %vm345_vm2, %v184_v1  ;;  %5912 = vmatmul.mubr.msk.f32.gmra.mrb[20].mxu1 %vm345_vm2, %v184_v1  ;;  %v4957_v1 = vld [vmem:[%s9371_s28 + $0x70] sm:$0xff] }
 0x11b   :  { %5856 = vmatprep.mubr.msk.f32.mxu0 %vm7527_vm0, %v7528_v6  ;;  %5914 = vmatprep.mubr.msk.f32.mxu1 %vm7527_vm0, %v7528_v6  ;;  %v6963_v8 = vpack.c.bf16 %v4958_v2, %v4957_v1  ;;  %v5002_v1 = vld [vmem:[%s9373_s4] ss:$0 sm:$0xff] }
 0x11c   :  { %6928 = vmatpush3.bf16.msra.mxu0 %v7681_v13 }
 0x11d   :  { %6929 = vmatprep.subr.bf16.mxu0 %v7526_v3 }
 0x11e   :  { %5857 = vmatmul.mubr.msk.f32.gmra.mrb[22].mxu0 %vm345_vm2, %v189_v9  ;;  %5915 = vmatmul.mubr.msk.f32.gmra.mrb[22].mxu1 %vm345_vm2, %v189_v9  ;;  %v4932_v9 = vld [vmem:[%s9372_s21 + $0xb8] sm:$0xff] }
 0x11f   :  { %5859 = vmatprep.mubr.msk.f32.mxu0 %vm7527_vm0, %v7528_v6  ;;  %5917 = vmatprep.mubr.msk.f32.mxu1 %vm7527_vm0, %v7528_v6 }
 0x122   :  { %5860 = vmatmul.mubr.msk.f32.gmra.mrb[24].mxu0 %vm345_vm2, %v194_v15  ;;  %5918 = vmatmul.mubr.msk.f32.gmra.mrb[24].mxu1 %vm345_vm2, %v194_v15  ;;  %v4936_v15 = vld [vmem:[%s9372_s21 + $0xd8] sm:$0xff] }
 0x123   :  { %5862 = vmatprep.mubr.msk.f32.mxu0 %vm7527_vm0, %v7528_v6  ;;  %5920 = vmatprep.mubr.msk.f32.mxu1 %vm7527_vm0, %v7528_v6 }
 0x126   :  { %5863 = vmatmul.mubr.msk.f32.gmra.mrb[26].mxu0 %vm345_vm2, %v199_v19  ;;  %5921 = vmatmul.mubr.msk.f32.gmra.mrb[26].mxu1 %vm345_vm2, %v199_v19 }
 0x127   :  { %5939 = vmatprep.mubr.msk.f32.mxu0 %vm7527_vm0, %v7528_v6  ;;  %5997 = vmatprep.mubr.msk.f32.mxu1 %vm7527_vm0, %v7528_v6 }
 0x12a   :  { %5940 = vmatmul.mubr.msk.f32.vlgmr.msra.gmra.mrb[28].mxu0 %vm81_vm1, %v4894_v30 }
 0x12b   :  { %5942 = vmatprep.mubr.msk.f32.mxu0 %vm7527_vm0, %v7528_v6  ;;  %6931 = vmatpush3.bf16.msra.mxu0 %v6930_v31  ;;  %v4981_v31 = vld [vmem:[%s9370_s25 + $0x88] sm:$0xff] }
 0x12c   :  { %6932 = vmatprep.subr.bf16.mxu0 %v7526_v3 }
 0x12e   :  { %5943 = vmatmul.mubr.msk.f32.gmra.mrb[30].mxu0 %vm81_vm1, %v4895_v34  ;;  %v4966_v34 = vld [vmem:[%s9372_s21 + $0xe0] sm:$0xff] }
 0x12f   :  { %5945 = vmatprep.mubr.msk.f32.mxu0 %vm7527_vm0, %v7528_v6  ;;  %6934 = vmatpush3.bf16.msra.mxu0 %v6933_v35 }
 0x130   :  { %6953 = vmatprep.subr.bf16.mxu0 %v7526_v3 }
 0x132   :  { %5946 = vmatmul.mubr.msk.f32.gmra.mrb[32].mxu0 %vm81_vm1, %v4896_v36  ;;  %v4982_v36 = vld [vmem:[%s9370_s25 + $0x90] sm:$0xff] }
 0x133   :  { %5948 = vmatprep.mubr.msk.f32.mxu0 %vm7527_vm0, %v7528_v6 }
 0x136   :  { %5949 = vmatmul.mubr.msk.f32.gmra.mrb[34].mxu0 %vm81_vm1, %v4897_v37  ;;  %v4983_v37 = vld [vmem:[%s9370_s25 + $0x98] sm:$0xff] }
 0x137   :  { %5951 = vmatprep.mubr.msk.f32.mxu0 %vm7527_vm0, %v7528_v6 }
 0x13a   :  { %5952 = vmatmul.mubr.msk.f32.gmra.mrb[36].mxu0 %vm81_vm1, %v4898_v38  ;;  %v4967_v38 = vld [vmem:[%s9372_s21 + $0xe8] sm:$0xff] }
 0x13b   :  { %5954 = vmatprep.mubr.msk.f32.mxu0 %vm7527_vm0, %v7528_v6 }
 0x13e   :  { %5955 = vmatmul.mubr.msk.f32.gmra.mrb[38].mxu0 %vm81_vm1, %v4899_v39  ;;  %v6981_v39 = vpack.c.bf16 %v4983_v37, %v4982_v36 }
 0x13f   :  { %5957 = vmatprep.mubr.msk.f32.mxu0 %vm7527_vm0, %v7528_v6 }
 0x142   :  { %5958 = vmatmul.mubr.msk.f32.gmra.mrb[40].mxu0 %vm81_vm1, %v4900_v40  ;;  %v4968_v40 = vld [vmem:[%s9372_s21 + $0xf0] sm:$0xff] }
 0x143   :  { %5968 = vmatprep.mubr.msk.f32.mxu0 %vm7527_vm0, %v7528_v6 }
 0x1fd   :  { %v888_v44 = vpop.f32.mrb[28].mxu0 }
 0x1fe   :  { %v5941_v47 = vpop.f32.mrb[29].mxu0  ;;  %5969 = vmatmul.mubr.msk.f32.vlgmr.msra.gmra.mrb[14].mxu0 %vm345_vm2, %v888_v44  ;;  %5998 = vmatmul.mubr.msk.f32.vlgmr.msra.gmra.mrb[14].mxu1 %vm345_vm2, %v888_v44  ;;  %v4972_v44 = vld [vmem:[%s9372_s21 + $0x110] sm:$0xff] }
 0x1ff   :  { %5971 = vmatprep.mubr.msk.f32.mxu0 %vm7527_vm0, %v7528_v6  ;;  %6000 = vmatprep.mubr.msk.f32.mxu1 %vm7527_vm0, %v7528_v6 }
 0x200   :  { %6943 = vmatpush3.bf16.msra.mxu1 %v7646_v4  ;;  %6955 = vmatpush3.bf16.msra.mxu0 %v6954_v43  ;;  %v4971_v43 = vld [vmem:[%s9372_s21 + $0x108] sm:$0xff] }
 0x201   :  { %v893_v49 = vpop.f32.mrb[30].mxu0  ;;  %6944 = vmatprep.subr.bf16.mxu1 %v7526_v3  ;;  %6956 = vmatprep.subr.bf16.mxu0 %v7526_v3 }
 0x202   :  { %v5944_v50 = vpop.f32.mrb[31].mxu0  ;;  %5972 = vmatmul.mubr.msk.f32.gmra.mrb[16].mxu0 %vm345_vm2, %v893_v49  ;;  %6001 = vmatmul.mubr.msk.f32.gmra.mrb[16].mxu1 %vm345_vm2, %v893_v49 }
 0x203   :  { %5974 = vmatprep.mubr.msk.f32.mxu0 %vm7527_vm0, %v7528_v6  ;;  %6003 = vmatprep.mubr.msk.f32.mxu1 %vm7527_vm0, %v7528_v6 }
 0x204   :  { %6946 = vmatpush3.bf16.msra.mxu1 %v7657_v7  ;;  %6958 = vmatpush3.bf16.msra.mxu0 %v6957_v48 }
 0x205   :  { %v898_v51 = vpop.f32.mrb[32].mxu0  ;;  %6947 = vmatprep.subr.bf16.mxu1 %v7526_v3  ;;  %6965 = vmatprep.subr.bf16.mxu0 %v7526_v3 }
 0x206   :  { %v5947_v52 = vpop.f32.mrb[33].mxu0  ;;  %5975 = vmatmul.mubr.msk.f32.gmra.mrb[18].mxu0 %vm345_vm2, %v898_v51  ;;  %6004 = vmatmul.mubr.msk.f32.gmra.mrb[18].mxu1 %vm345_vm2, %v898_v51 }
 0x207   :  { %5977 = vmatprep.mubr.msk.f32.mxu0 %vm7527_vm0, %v7528_v6  ;;  %6006 = vmatprep.mubr.msk.f32.mxu1 %vm7527_vm0, %v7528_v6 }
 0x208   :  { %6949 = vmatpush3.bf16.msra.mxu1 %v7669_v10 }
 0x209   :  { %v903_v53 = vpop.f32.mrb[34].mxu0  ;;  %6950 = vmatprep.subr.bf16.mxu1 %v7526_v3 }
 0x20a   :  { %v5950_v54 = vpop.f32.mrb[35].mxu0  ;;  %5978 = vmatmul.mubr.msk.f32.gmra.mrb[20].mxu0 %vm345_vm2, %v903_v53  ;;  %6007 = vmatmul.mubr.msk.f32.gmra.mrb[20].mxu1 %vm345_vm2, %v903_v53 }
 0x20b   :  { %5980 = vmatprep.mubr.msk.f32.mxu0 %vm7527_vm0, %v7528_v6  ;;  %6009 = vmatprep.mubr.msk.f32.mxu1 %vm7527_vm0, %v7528_v6 }
 0x20c   :  { %6952 = vmatpush3.bf16.msra.mxu1 %v7681_v13 }
 0x20d   :  { %v908_v55 = vpop.f32.mrb[36].mxu0  ;;  %6959 = vmatprep.subr.bf16.mxu1 %v7526_v3 }
 0x20e   :  { %v5953_v56 = vpop.f32.mrb[37].mxu0  ;;  %5981 = vmatmul.mubr.msk.f32.gmra.mrb[22].mxu0 %vm345_vm2, %v908_v55  ;;  %6010 = vmatmul.mubr.msk.f32.gmra.mrb[22].mxu1 %vm345_vm2, %v908_v55 }
 0x20f   :  { %5983 = vmatprep.mubr.msk.f32.mxu0 %vm7527_vm0, %v7528_v6  ;;  %6012 = vmatprep.mubr.msk.f32.mxu1 %vm7527_vm0, %v7528_v6 }
 0x211   :  { %v913_v57 = vpop.f32.mrb[38].mxu0 }
 0x212   :  { %v5956_v58 = vpop.f32.mrb[39].mxu0  ;;  %5984 = vmatmul.mubr.msk.f32.gmra.mrb[24].mxu0 %vm345_vm2, %v913_v57  ;;  %6013 = vmatmul.mubr.msk.f32.gmra.mrb[24].mxu1 %vm345_vm2, %v913_v57 }
 0x213   :  { %5986 = vmatprep.mubr.msk.f32.mxu0 %vm7527_vm0, %v7528_v6  ;;  %6015 = vmatprep.mubr.msk.f32.mxu1 %vm7527_vm0, %v7528_v6 }
 0x215   :  { %v918_v61 = vpop.f32.mrb[40].mxu0 }
 0x216   :  { %v5959_v62 = vpop.f32.mrb[41].mxu0  ;;  %5987 = vmatmul.mubr.msk.f32.gmra.mrb[26].mxu0 %vm345_vm2, %v918_v61  ;;  %6016 = vmatmul.mubr.msk.f32.gmra.mrb[26].mxu1 %vm345_vm2, %v918_v61 }
 0x217   :  { %6034 = vmatprep.mubr.msk.f32.mxu1 %vm7527_vm0, %v7528_v6  ;;  %6063 = vmatprep.mubr.msk.f32.mxu0 %vm7527_vm0, %v7528_v6 }
 0x21a   :  { %6035 = vmatmul.mubr.msk.f32.vlgmr.msra.gmra.mrb[28].mxu1 %vm81_vm1, %v4930_v63 }
 0x21b   :  { %6037 = vmatprep.mubr.msk.f32.mxu1 %vm7527_vm0, %v7528_v6  ;;  %6961 = vmatpush3.bf16.msra.mxu1 %v6960_v0 }
 0x21c   :  { %6962 = vmatprep.subr.bf16.mxu1 %v7526_v3 }
 0x21e   :  { %6038 = vmatmul.mubr.msk.f32.gmra.mrb[30].mxu1 %vm81_vm1, %v4931_v5 }
 0x21f   :  { %6040 = vmatprep.mubr.msk.f32.mxu1 %vm7527_vm0, %v7528_v6  ;;  %6964 = vmatpush3.bf16.msra.mxu1 %v6963_v8 }
 0x220   :  { %6983 = vmatprep.subr.bf16.mxu1 %v7526_v3 }
 0x222   :  { %6041 = vmatmul.mubr.msk.f32.gmra.mrb[32].mxu1 %vm81_vm1, %v4932_v9 }
 0x223   :  { %6043 = vmatprep.mubr.msk.f32.mxu1 %vm7527_vm0, %v7528_v6 }
 0x226   :  { %6044 = vmatmul.mubr.msk.f32.gmra.mrb[34].mxu1 %vm81_vm1, %v4933_v11 }
 0x227   :  { %6046 = vmatprep.mubr.msk.f32.mxu1 %vm7527_vm0, %v7528_v6 }
 0x22a   :  { %6047 = vmatmul.mubr.msk.f32.gmra.mrb[36].mxu1 %vm81_vm1, %v4934_v12 }
 0x22b   :  { %6049 = vmatprep.mubr.msk.f32.mxu1 %vm7527_vm0, %v7528_v6 }
 0x22e   :  { %6050 = vmatmul.mubr.msk.f32.gmra.mrb[38].mxu1 %vm81_vm1, %v4935_v14 }
 0x22f   :  { %6052 = vmatprep.mubr.msk.f32.mxu1 %vm7527_vm0, %v7528_v6 }
 0x232   :  { %6053 = vmatmul.mubr.msk.f32.gmra.mrb[40].mxu1 %vm81_vm1, %v4936_v15 }
 0x233   :  { %6092 = vmatprep.mubr.msk.f32.mxu1 %vm7527_vm0, %v7528_v6 }
 0x2ed   :  { %v1262_v19 = vpop.f32.mrb[28].mxu1 }
 0x2ee   :  { %v6036_v22 = vpop.f32.mrb[29].mxu1  ;;  %6064 = vmatmul.mubr.msk.f32.vlgmr.msra.gmra.mrb[14].mxu0 %vm345_vm2, %v1262_v19  ;;  %6093 = vmatmul.mubr.msk.f32.vlgmr.msra.gmra.mrb[14].mxu1 %vm345_vm2, %v1262_v19 }
 0x2ef   :  { %6066 = vmatprep.mubr.msk.f32.mxu0 %vm7527_vm0, %v7528_v6  ;;  %6095 = vmatprep.mubr.msk.f32.mxu1 %vm7527_vm0, %v7528_v6 }
 0x2f0   :  { %6967 = vmatpush3.bf16.msra.mxu0 %v7646_v4  ;;  %6985 = vmatpush3.bf16.msra.mxu1 %v6984_v18 }
 0x2f1   :  { %v1267_v24 = vpop.f32.mrb[30].mxu1  ;;  %6968 = vmatprep.subr.bf16.mxu0 %v7526_v3  ;;  %6986 = vmatprep.subr.bf16.mxu1 %v7526_v3 }
 0x2f2   :  { %v6039_v25 = vpop.f32.mrb[31].mxu1  ;;  %6067 = vmatmul.mubr.msk.f32.gmra.mrb[16].mxu0 %vm345_vm2, %v1267_v24  ;;  %6096 = vmatmul.mubr.msk.f32.gmra.mrb[16].mxu1 %vm345_vm2, %v1267_v24 }
 0x2f3   :  { %6069 = vmatprep.mubr.msk.f32.mxu0 %vm7527_vm0, %v7528_v6  ;;  %6098 = vmatprep.mubr.msk.f32.mxu1 %vm7527_vm0, %v7528_v6 }
 0x2f4   :  { %6970 = vmatpush3.bf16.msra.mxu0 %v7657_v7  ;;  %6988 = vmatpush3.bf16.msra.mxu1 %v6987_v23 }
 0x2f5   :  { %v1272_v4 = vpop.f32.mrb[32].mxu1  ;;  %6971 = vmatprep.subr.bf16.mxu0 %v7526_v3 }
 0x2f6   :  { %v6042_v26 = vpop.f32.mrb[33].mxu1  ;;  %6070 = vmatmul.mubr.msk.f32.gmra.mrb[18].mxu0 %vm345_vm2, %v1272_v4  ;;  %6099 = vmatmul.mubr.msk.f32.gmra.mrb[18].mxu1 %vm345_vm2, %v1272_v4 }
 0x2f7   :  { %6072 = vmatprep.mubr.msk.f32.mxu0 %vm7527_vm0, %v7528_v6  ;;  %6101 = vmatprep.mubr.msk.f32.mxu1 %vm7527_vm0, %v7528_v6 }
 0x2f8   :  { %6973 = vmatpush3.bf16.msra.mxu0 %v7669_v10 }
 0x2f9   :  { %v1277_v27 = vpop.f32.mrb[34].mxu1  ;;  %6974 = vmatprep.subr.bf16.mxu0 %v7526_v3 }
 0x2fa   :  { %v6045_v7 = vpop.f32.mrb[35].mxu1  ;;  %6073 = vmatmul.mubr.msk.f32.gmra.mrb[20].mxu0 %vm345_vm2, %v1277_v27  ;;  %6102 = vmatmul.mubr.msk.f32.gmra.mrb[20].mxu1 %vm345_vm2, %v1277_v27 }
 0x2fb   :  { %6075 = vmatprep.mubr.msk.f32.mxu0 %vm7527_vm0, %v7528_v6  ;;  %6104 = vmatprep.mubr.msk.f32.mxu1 %vm7527_vm0, %v7528_v6 }
 0x2fc   :  { %6976 = vmatpush3.bf16.msra.mxu0 %v7681_v13  ;;  %v4980_v13 = vld [vmem:[%s9370_s25 + $0x80] sm:$0xff] }
 0x2fd   :  { %v1282_v28 = vpop.f32.mrb[36].mxu1  ;;  %6977 = vmatprep.subr.bf16.mxu0 %v7526_v3  ;;  %v6978_v35 = vpack.c.bf16 %v4981_v31, %v4980_v13 }
 0x2fe   :  { %v6048_v10 = vpop.f32.mrb[37].mxu1  ;;  %6076 = vmatmul.mubr.msk.f32.gmra.mrb[22].mxu0 %vm345_vm2, %v1282_v28  ;;  %6105 = vmatmul.mubr.msk.f32.gmra.mrb[22].mxu1 %vm345_vm2, %v1282_v28 }
 0x2ff   :  { %6078 = vmatprep.mubr.msk.f32.mxu0 %vm7527_vm0, %v7528_v6  ;;  %6107 = vmatprep.mubr.msk.f32.mxu1 %vm7527_vm0, %v7528_v6 }
 0x301   :  { %v1287_v29 = vpop.f32.mrb[38].mxu1 }
 0x302   :  { %v6051_v30 = vpop.f32.mrb[39].mxu1  ;;  %6079 = vmatmul.mubr.msk.f32.gmra.mrb[24].mxu0 %vm345_vm2, %v1287_v29  ;;  %6108 = vmatmul.mubr.msk.f32.gmra.mrb[24].mxu1 %vm345_vm2, %v1287_v29 }
 0x303   :  { %6081 = vmatprep.mubr.msk.f32.mxu0 %vm7527_vm0, %v7528_v6  ;;  %6110 = vmatprep.mubr.msk.f32.mxu1 %vm7527_vm0, %v7528_v6 }
 0x305   :  { %v1292_v32 = vpop.f32.mrb[40].mxu1 }
 0x306   :  { %v6054_v33 = vpop.f32.mrb[41].mxu1  ;;  %6082 = vmatmul.mubr.msk.f32.gmra.mrb[26].mxu0 %vm345_vm2, %v1292_v32  ;;  %6111 = vmatmul.mubr.msk.f32.gmra.mrb[26].mxu1 %vm345_vm2, %v1292_v32 }
 0x307   :  { %6129 = vmatprep.mubr.msk.f32.mxu0 %vm7527_vm0, %v7528_v6  ;;  %6187 = vmatprep.mubr.msk.f32.mxu1 %vm7527_vm0, %v7528_v6 }
 0x30a   :  { %6130 = vmatmul.mubr.msk.f32.vlgmr.msra.gmra.mrb[42].mxu0 %vm81_vm1, %v4966_v34 }
 0x30b   :  { %6132 = vmatprep.mubr.msk.f32.mxu0 %vm7527_vm0, %v7528_v6  ;;  %6979 = vmatpush3.bf16.msra.mxu0 %v6978_v35 }
 0x30c   :  { %6980 = vmatprep.subr.bf16.mxu0 %v7526_v3 }
 0x30e   :  { %6133 = vmatmul.mubr.msk.f32.gmra.mrb[44].mxu0 %vm81_vm1, %v4967_v38 }
 0x30f   :  { %6135 = vmatprep.mubr.msk.f32.mxu0 %vm7527_vm0, %v7528_v6  ;;  %6982 = vmatpush3.bf16.msra.mxu0 %v6981_v39 }
 0x310   :  { %7020 = vmatprep.subr.bf16.mxu0 %v7526_v3 }
 0x312   :  { %6136 = vmatmul.mubr.msk.f32.gmra.mrb[46].mxu0 %vm81_vm1, %v4968_v40 }
 0x313   :  { %6138 = vmatprep.mubr.msk.f32.mxu0 %vm7527_vm0, %v7528_v6 }
 0x316   :  { %6139 = vmatmul.mubr.msk.f32.gmra.mrb[48].mxu0 %vm81_vm1, %v4969_v41 }
 0x317   :  { %6141 = vmatprep.mubr.msk.f32.mxu0 %vm7527_vm0, %v7528_v6 }
 0x31a   :  { %6142 = vmatmul.mubr.msk.f32.gmra.mrb[50].mxu0 %vm81_vm1, %v4970_v42 }
 0x31b   :  { %6144 = vmatprep.mubr.msk.f32.mxu0 %vm7527_vm0, %v7528_v6 }
 0x31e   :  { %6145 = vmatmul.mubr.msk.f32.gmra.mrb[52].mxu0 %vm81_vm1, %v4971_v43 }
 0x31f   :  { %6147 = vmatprep.mubr.msk.f32.mxu0 %vm7527_vm0, %v7528_v6 }
 0x322   :  { %6148 = vmatmul.mubr.msk.f32.gmra.mrb[54].mxu0 %vm81_vm1, %v4972_v44 }
 0x323   :  { %6158 = vmatprep.mubr.msk.f32.mxu0 %vm7527_vm0, %v7528_v6 }
 0x3dd   :  { %v1636_v45 = vpop.f32.mrb[42].mxu0 }
 0x3de   :  { %v6131_v46 = vpop.f32.mrb[43].mxu0  ;;  %6159 = vmatmul.mubr.msk.f32.vlgmr.msra.gmra.mrb[14].mxu0 %vm345_vm2, %v1636_v45  ;;  %6188 = vmatmul.mubr.msk.f32.vlgmr.msra.gmra.mrb[14].mxu1 %vm345_vm2, %v1636_v45 }
 0x3df   :  { %6161 = vmatprep.mubr.msk.f32.mxu0 %vm7527_vm0, %v7528_v6  ;;  %6190 = vmatprep.mubr.msk.f32.mxu1 %vm7527_vm0, %v7528_v6 }
 0x3e1   :  { %v1641_v47 = vpop.f32.mrb[44].mxu0 }
 0x3e2   :  { %v6134_v48 = vpop.f32.mrb[45].mxu0  ;;  %6162 = vmatmul.mubr.msk.f32.gmra.mrb[16].mxu0 %vm345_vm2, %v1641_v47  ;;  %6191 = vmatmul.mubr.msk.f32.gmra.mrb[16].mxu1 %vm345_vm2, %v1641_v47 }
 0x3e3   :  { %6164 = vmatprep.mubr.msk.f32.mxu0 %vm7527_vm0, %v7528_v6  ;;  %6193 = vmatprep.mubr.msk.f32.mxu1 %vm7527_vm0, %v7528_v6 }
 0x3e5   :  { %v1646_v49 = vpop.f32.mrb[46].mxu0 }
 0x3e6   :  { %v6137_v50 = vpop.f32.mrb[47].mxu0  ;;  %6165 = vmatmul.mubr.msk.f32.gmra.mrb[18].mxu0 %vm345_vm2, %v1646_v49  ;;  %6194 = vmatmul.mubr.msk.f32.gmra.mrb[18].mxu1 %vm345_vm2, %v1646_v49 }
 0x3e7   :  { %6167 = vmatprep.mubr.msk.f32.mxu0 %vm7527_vm0, %v7528_v6  ;;  %6196 = vmatprep.mubr.msk.f32.mxu1 %vm7527_vm0, %v7528_v6 }
 0x3e9   :  { %v1651_v51 = vpop.f32.mrb[48].mxu0 }
 0x3ea   :  { %v6140_v52 = vpop.f32.mrb[49].mxu0  ;;  %6168 = vmatmul.mubr.msk.f32.gmra.mrb[20].mxu0 %vm345_vm2, %v1651_v51  ;;  %6197 = vmatmul.mubr.msk.f32.gmra.mrb[20].mxu1 %vm345_vm2, %v1651_v51  ;;  %v1944_v51 = vld [vmem:[%s9344_s5 + $0x8] sm:$0xff] }
 0x3eb   :  { %6170 = vmatprep.mubr.msk.f32.mxu0 %vm7527_vm0, %v7528_v6  ;;  %6199 = vmatprep.mubr.msk.f32.mxu1 %vm7527_vm0, %v7528_v6  ;;  %v1945_v52 = vld [vmem:[%s9344_s5 + $0x10] sm:$0xff] }
 0x3ed   :  { %v1656_v53 = vpop.f32.mrb[50].mxu0 }
 0x3ee   :  { %v6143_v54 = vpop.f32.mrb[51].mxu0  ;;  %6171 = vmatmul.mubr.msk.f32.gmra.mrb[22].mxu0 %vm345_vm2, %v1656_v53  ;;  %6200 = vmatmul.mubr.msk.f32.gmra.mrb[22].mxu1 %vm345_vm2, %v1656_v53  ;;  %v1946_v53 = vld [vmem:[%s9344_s5 + $0x18] sm:$0xf] }
 0x3ef   :  { %6173 = vmatprep.mubr.msk.f32.mxu0 %vm7527_vm0, %v7528_v6  ;;  %6202 = vmatprep.mubr.msk.f32.mxu1 %vm7527_vm0, %v7528_v6  ;;  %v2045_v54 = vld [vmem:[%s9345_s6] sm:$0xff] }
 0x3f1   :  { %v1661_v55 = vpop.f32.mrb[52].mxu0 }
 0x3f2   :  { %v6146_v56 = vpop.f32.mrb[53].mxu0  ;;  %6174 = vmatmul.mubr.msk.f32.gmra.mrb[24].mxu0 %vm345_vm2, %v1661_v55  ;;  %6203 = vmatmul.mubr.msk.f32.gmra.mrb[24].mxu1 %vm345_vm2, %v1661_v55  ;;  %v2046_v55 = vld [vmem:[%s9345_s6 + $0x8] sm:$0xff] }
 0x3f3   :  { %6176 = vmatprep.mubr.msk.f32.mxu0 %vm7527_vm0, %v7528_v6  ;;  %6205 = vmatprep.mubr.msk.f32.mxu1 %vm7527_vm0, %v7528_v6  ;;  %v2047_v56 = vld [vmem:[%s9345_s6 + $0x10] sm:$0xff] }
 0x3f5   :  { %v1666_v57 = vpop.f32.mrb[54].mxu0 }
 0x3f6   :  { %6177 = vmatmul.mubr.msk.f32.gmra.mrb[26].mxu0 %vm345_vm2, %v1666_v57  ;;  %6206 = vmatmul.mubr.msk.f32.gmra.mrb[26].mxu1 %vm345_vm2, %v1666_v57  ;;  %v6149_v58 = vpop.f32.mrb[55].mxu0  ;;  %v2048_v57 = vld [vmem:[%s9345_s6 + $0x18] sm:$0xf] }
 0x3f7   :  { %6273 = vmatprep.mubr.msk.f32.mxu0 %vm7527_vm0, %v7528_v6  ;;  %6222 = vmatprep.mubr.msk.f32.mxu1 %vm1947_vm3, %v1943_v59 }
 0x4b1   :  { %v1762_v60 = vpop.f32.mrb[14].mxu0  ;;  %v1874_v61 = vpop.f32.mrb[14].mxu1 }
 0x4b2   :  { %v1915_v62 = vmax.f32 %v1762_v60, %v1874_v61  ;;  %v6160_v63 = vpop.f32.mrb[15].mxu0  ;;  %v6189_v0 = vpop.f32.mrb[15].mxu1 }
 0x4b4   :  { %v1929_v8 = vadd.f32 %v5002_v1, %v1915_v62 }
 0x4b5   :  { %v1767_v2 = vpop.f32.mrb[16].mxu0  ;;  %v1879_v5 = vpop.f32.mrb[16].mxu1 }
 0x4b6   :  { %v1916_v9 = vmax.f32 %v1767_v2, %v1879_v5  ;;  %v6163_v11 = vpop.f32.mrb[17].mxu0  ;;  %v6192_v12 = vpop.f32.mrb[17].mxu1  ;;  %v1936_v17 = vmax.f32 %v1929_v8, 0.0 }
 0x4b7   :  { %v5160_v12 = vld [vmem:[%s9348_s9 + $0x180] sm:$0xff] }
 0x4b8   :  { %v1930_v14 = vadd.f32 %v5002_v1, %v1916_v9 }
 0x4b9   :  { %v1772_v15 = vpop.f32.mrb[18].mxu0  ;;  %v1884_v16 = vpop.f32.mrb[18].mxu1 }
 0x4ba   :  { %v1937_v18 = vmax.f32 %v1930_v14, 0.0  ;;  %v1917_v19 = vmax.f32 %v1772_v15, %v1884_v16  ;;  %v6166_v20 = vpop.f32.mrb[19].mxu0  ;;  %v6195_v21 = vpop.f32.mrb[19].mxu1  ;;  %v5022_v14 = vld [vmem:[%s9347_s8 + $0x58] sm:$0xff]  ;;  %v5023_v16 = vld [vmem:[%s9347_s8 + $0x60] sm:$0xff] }
 0x4bb   :  { %v2150_v20 = vld [vmem:[%s9346_s7] sm:$0xff]  ;;  %v7028_v21 = vpack.c.bf16 %v5023_v16, %v5022_v14 }
 0x4bc   :  { %v6989_v22 = vpack.c.bf16 %v1937_v18, %v1936_v17  ;;  %v1931_v25 = vadd.f32 %v5002_v1, %v1917_v19  ;;  %v5041_v17 = vld [vmem:[%s9348_s9 + $0x58] sm:$0xff]  ;;  %v5042_v18 = vld [vmem:[%s9348_s9 + $0x60] sm:$0xff] }
 0x4bd   :  { %v1777_v23 = vpop.f32.mrb[20].mxu0  ;;  %v1889_v24 = vpop.f32.mrb[20].mxu1  ;;  %v5015_v19 = vld [vmem:[%s9346_s7 + $0x18] sm:$0xff] }
 0x4be   :  { %v1918_v4 = vmax.f32 %v1777_v23, %v1889_v24  ;;  %v6169_v26 = vpop.f32.mrb[21].mxu0  ;;  %v6198_v27 = vpop.f32.mrb[21].mxu1  ;;  %6990 = vmatprep.subr.bf16.mxu1 %v6989_v22  ;;  %v1938_v29 = vmax.f32 %v1931_v25, 0.0  ;;  %v7058_v23 = vpack.c.bf16 %v5042_v18, %v5041_v17  ;;  %v5025_v24 = vld [vmem:[%s9347_s8 + $0x70] sm:$0xff]  ;;  %v5043_v25 = vld [vmem:[%s9348_s9 + $0x68] sm:$0xff] }
 0x4bf   :  { %6992 = vmatpush3.bf16.msra.mxu1 %v6989_v22  ;;  %v5016_v26 = vld [vmem:[%s9346_s7 + $0x20] sm:$0xff]  ;;  %v2151_v27 = vld [vmem:[%s9346_s7 + $0x8] sm:$0xff] }
 0x4c0   :  { %v1932_v7 = vadd.f32 %v5002_v1, %v1918_v4  ;;  %v5044_v4 = vld [vmem:[%s9348_s9 + $0x70] sm:$0xff] }
 0x4c1   :  { %v1782_v28 = vpop.f32.mrb[22].mxu0  ;;  %v1894_v10 = vpop.f32.mrb[22].mxu1 }
 0x4c2   :  { %v1939_v30 = vmax.f32 %v1932_v7, 0.0  ;;  %v1919_v13 = vmax.f32 %v1782_v28, %v1894_v10  ;;  %v6172_v31 = vpop.f32.mrb[23].mxu0  ;;  %v6201_v32 = vpop.f32.mrb[23].mxu1  ;;  %v7061_v28 = vpack.c.bf16 %v5044_v4, %v5043_v25  ;;  %v5026_v10 = vld [vmem:[%s9347_s8 + $0x78] sm:$0xff] }
 0x4c3   :  { %v5028_v32 = vld [vmem:[%s9347_s8 + $0x88] sm:$0xff] }
 0x4c4   :  { %v6993_v33 = vpack.c.bf16 %v1939_v30, %v1938_v29  ;;  %v1933_v36 = vadd.f32 %v5002_v1, %v1919_v13  ;;  %v5027_v29 = vld [vmem:[%s9347_s8 + $0x80] sm:$0xff]  ;;  %v5017_v30 = vld [vmem:[%s9346_s7 + $0x28] sm:$0xf]  ;;  %v2152_v13 = vld [vmem:[%s9346_s7 + $0x10] sm:$0xf] }
 0x4c5   :  { %v1787_v34 = vpop.f32.mrb[24].mxu0  ;;  %v1899_v35 = vpop.f32.mrb[24].mxu1  ;;  %v7034_v31 = vpack.c.bf16 %v5027_v29, %v5026_v10  ;;  %v2266_v29 = vld [vmem:[%s9348_s9 + $0x40] sm:$0xff] }
 0x4c6   :  { %v1920_v37 = vmax.f32 %v1787_v34, %v1899_v35  ;;  %v6175_v38 = vpop.f32.mrb[25].mxu0  ;;  %v6204_v39 = vpop.f32.mrb[25].mxu1  ;;  %6994 = vmatprep.subr.bf16.mxu1 %v6993_v33  ;;  %v1940_v43 = vmax.f32 %v1933_v36, 0.0  ;;  %v5030_v35 = vld [vmem:[%s9347_s8 + $0x98] sm:$0xff]  ;;  %v5031_v36 = vld [vmem:[%s9347_s8 + $0xa0] sm:$0xff] }
 0x4c7   :  { %6996 = vmatpush3.bf16.msra.mxu1 %v6993_v33  ;;  %v5032_v38 = vld [vmem:[%s9347_s8 + $0xa8] sm:$0xf]  ;;  %v5045_v39 = vld [vmem:[%s9348_s9 + $0x78] sm:$0xff] }
 0x4c8   :  { %v1934_v40 = vadd.f32 %v5002_v1, %v1920_v37  ;;  %v7040_v37 = vpack.c.bf16 %v5031_v36, %v5030_v35  ;;  %v5083_v35 = vld [vmem:[%s9348_s9 + $0xb8] sm:$0xff] }
 0x4c9   :  { %v1792_v41 = vpop.f32.mrb[26].mxu0  ;;  %v1904_v42 = vpop.f32.mrb[26].mxu1 }
 0x4ca   :  { %v1941_v44 = vmax.f32 %v1934_v40, 0.0  ;;  %v1921_v45 = vmax.f32 %v1792_v41, %v1904_v42  ;;  %v6178_v46 = vpop.f32.mrb[27].mxu0  ;;  %v6207_v47 = vpop.f32.mrb[27].mxu1  ;;  %v5046_v40 = vld [vmem:[%s9348_s9 + $0x80] sm:$0xff]  ;;  %v5047_v42 = vld [vmem:[%s9348_s9 + $0x88] sm:$0xff] }
 0x4cb   :  { %v7064_v41 = vpack.c.bf16 %v5046_v40, %v5045_v39  ;;  %v5050_v46 = vld [vmem:[%s9348_s9 + $0xa0] sm:$0xff]  ;;  %v5067_v40 = vld [vmem:[%s9347_s8 + $0xb0] sm:$0xff] }
 0x4cc   :  { %v6997_v48 = vpack.c.bf16 %v1941_v44, %v1940_v43  ;;  %v1935_v49 = vadd.f32 %v5002_v1, %v1921_v45  ;;  %v5048_v43 = vld [vmem:[%s9348_s9 + $0x90] sm:$0xff]  ;;  %v5049_v45 = vld [vmem:[%s9348_s9 + $0x98] sm:$0xff] }
 0x4cd   :  { %v7067_v44 = vpack.c.bf16 %v5048_v43, %v5047_v42  ;;  %v7070_v47 = vpack.c.bf16 %v5050_v46, %v5049_v45  ;;  %v5086_v42 = vld [vmem:[%s9348_s9 + $0xd0] sm:$0xff]  ;;  %v5087_v43 = vld [vmem:[%s9348_s9 + $0xd8] sm:$0xff] }
 0x4ce   :  { %v1942_v50 = vmax.f32 %v1935_v49, 0.0  ;;  %6998 = vmatprep.subr.bf16.mxu1 %v6997_v48  ;;  %v2247_v49 = vld [vmem:[%s9347_s8] sm:$0xff]  ;;  %v7116_v46 = vpack.c.bf16 %v5087_v43, %v5086_v42  ;;  %v5124_v42 = vld [vmem:[%s9348_s9 + $0x130] sm:$0xff] }
 0x4cf   :  { %7000 = vmatpush3.bf16.msra.mxu1 %v6997_v48 }
 0x4d0   :  { %6220 = vmatprep.subr.mxu1 %v1942_v50 }
 0x4d3   :  { %6221 = vmatpush3.msra.mxu1 %v1942_v50 }
 0x4d4   :  { %6223 = vmatmul.mubr.msk.f32.vlgmr.msra.gmra.mrb[42].mxu1 %vm1947_vm3, %v1944_v51  ;;  %7002 = vmatprep.subr.bf16.mxu1 %v6989_v22  ;;  %v2258_v51 = vld [vmem:[%s9348_s9] sm:$0xff] }
 0x4d5   :  { %7004 = vmatpush3.bf16.msra.mxu1 %v6989_v22  ;;  %6225 = vmatprep.mubr.msk.f32.mxu1 %vm1947_vm3, %v1945_v52  ;;  %v5024_v22 = vld [vmem:[%s9347_s8 + $0x68] sm:$0xff] }
 0x4d6   :  { %7006 = vmatprep.subr.bf16.mxu1 %v6993_v33  ;;  %v7031_v7 = vpack.c.bf16 %v5025_v24, %v5024_v22  ;;  %v2259_v52 = vld [vmem:[%s9348_s9 + $0x8] sm:$0xff]  ;;  %v2265_v24 = vld [vmem:[%s9348_s9 + $0x38] sm:$0xff] }
 0x4d8   :  { %6226 = vmatmul.mubr.msk.f32.gmra.mrb[44].mxu1 %vm1947_vm3, %v1946_v53 }
 0x4d9   :  { %7008 = vmatpush3.bf16.msra.mxu1 %v6993_v33  ;;  %6242 = vmatprep.mubr.msk.f32.mxu1 %vm1947_vm3, %v2045_v54  ;;  %v5029_v33 = vld [vmem:[%s9347_s8 + $0x90] sm:$0xff] }
 0x4da   :  { %7010 = vmatprep.subr.bf16.mxu1 %v6997_v48  ;;  %v7037_v34 = vpack.c.bf16 %v5029_v33, %v5028_v32  ;;  %v2249_v54 = vld [vmem:[%s9347_s8 + $0x10] sm:$0xff] }
 0x4db   :  { %v2257_v32 = vld [vmem:[%s9347_s8 + $0x50] sm:$0xf] }
 0x4dc   :  { %v2268_v33 = vld [vmem:[%s9348_s9 + $0x50] sm:$0xf] }
 0x4dd   :  { %7012 = vmatpush3.bf16.msra.mxu1 %v6997_v48  ;;  %v5051_v48 = vld [vmem:[%s9348_s9 + $0xa8] sm:$0xf] }
 0x4de   :  { %6240 = vmatprep.subr.mxu1 %v1942_v50 }
 0x4e1   :  { %6241 = vmatpush3.msra.mxu1 %v1942_v50  ;;  %v2248_v50 = vld [vmem:[%s9347_s8 + $0x8] sm:$0xff] }
 0x4e2   :  { %6243 = vmatmul.mubr.msk.f32.vlgmr.msra.gmra.mrb[46].mxu1 %vm1947_vm3, %v2046_v55  ;;  %7013 = vmatprep.subr.bf16.mxu1 %v7526_v3  ;;  %v7043_v53 = vpack.c.bf16 %v2248_v50, %v2247_v49  ;;  %v2250_v55 = vld [vmem:[%s9347_s8 + $0x18] sm:$0xff]  ;;  %v5088_v49 = vld [vmem:[%s9348_s9 + $0xe0] sm:$0xff]  ;;  %v5089_v50 = vld [vmem:[%s9348_s9 + $0xe8] sm:$0xff] }
 0x4e3   :  { %6245 = vmatprep.mubr.msk.f32.mxu1 %vm1947_vm3, %v2047_v56  ;;  %v7073_v56 = vpack.c.bf16 %v2259_v52, %v2258_v51  ;;  %v5061_v51 = vld [vmem:[%s9346_s7 + $0x38] sm:$0xff] }
 0x4e6   :  { %6246 = vmatmul.mubr.msk.f32.gmra.mrb[48].mxu1 %vm1947_vm3, %v2048_v57 }
 0x4e7   :  { %6256 = vmatprep.mubr.msk.f32.mxu1 %vm7527_vm0, %v7528_v6 }
 0x5a7   :  { %v6224_v58 = vpop.f32.mrb[42].mxu1 }
 0x5a8   :  { %v2026_v59 = vpop.f32.mrb[43].mxu1 }
 0x5ab   :  { %v6227_v60 = vpop.f32.mrb[44].mxu1 }
 0x5ac   :  { %v2036_v61 = vpop.f32.mrb[45].mxu1 }
 0x5b5   :  { %v6244_v62 = vpop.f32.mrb[46].mxu1 }
 0x5b6   :  { %v2147_v63 = vmax.f32 %v6224_v58, %v6244_v62  ;;  %v2127_v0 = vpop.f32.mrb[47].mxu1  ;;  %v2260_v58 = vld [vmem:[%s9348_s9 + $0x10] sm:$0xff] }
 0x5b7   :  { %v2146_v1 = vmax.f32 %v2026_v59, %v2127_v0  ;;  %v2261_v59 = vld [vmem:[%s9348_s9 + $0x18] sm:$0xff]  ;;  %v2251_v0 = vld [vmem:[%s9347_s8 + $0x20] sm:$0xff] }
 0x5b9   :  { %v8321_v2 = vpack.c.bf16 %v2147_v63, %v2146_v1  ;;  %v6247_v5 = vpop.f32.mrb[48].mxu1  ;;  %v7046_v63 = vpack.c.bf16 %v2250_v55, %v2249_v54  ;;  %v2252_v1 = vld [vmem:[%s9347_s8 + $0x28] sm:$0xff]  ;;  %v5090_v54 = vld [vmem:[%s9348_s9 + $0xf0] sm:$0xff]  ;;  %v5091_v55 = vld [vmem:[%s9348_s9 + $0xf8] sm:$0xff] }
 0x5ba   :  { %v2149_v8 = vmax.f32 %v6227_v60, %v6247_v5  ;;  %v2137_v9 = vpop.f32.mrb[49].mxu1  ;;  %v7076_v5 = vpack.c.bf16 %v2261_v59, %v2260_v58  ;;  %v7049_v18 = vpack.c.bf16 %v2252_v1, %v2251_v0  ;;  %v5092_v58 = vld [vmem:[%s9348_s9 + $0x100] sm:$0xf]  ;;  %v5071_v59 = vld [vmem:[%s9347_s8 + $0xd0] sm:$0xff] }
 0x5bb   :  { %v2148_v11 = vmax.f32 %v2036_v61, %v2137_v9  ;;  %7015 = vmatpush3.bf16.msra.mxu1 %v8321_v2  ;;  %7022 = vmatpush3.bf16.msra.mxu0 %v8321_v2  ;;  %v2262_v9 = vld [vmem:[%s9348_s9 + $0x20] sm:$0xff]  ;;  %v5075_v1 = vld [vmem:[%s9347_s8 + $0xf0] sm:$0xff] }
 0x5bc   :  { %7016 = vmatprep.subr.bf16.mxu1 %v7526_v3  ;;  %7023 = vmatprep.subr.bf16.mxu0 %v7526_v3 }
 0x5bd   :  { %v8336_v15 = vpack.c.bf16 %v2149_v8, %v2148_v11  ;;  %v2263_v11 = vld [vmem:[%s9348_s9 + $0x28] sm:$0xff] }
 0x5bf   :  { %7019 = vmatpush3.bf16.msk.msra.mxu1 %vm8329_vm6, %v8336_v15  ;;  %7026 = vmatpush3.bf16.msk.msra.mxu0 %vm8329_vm6, %v8336_v15 }
 0x5c0   :  { %7027 = vmatprep.subr.bf16.mxu1 %v7526_v3  ;;  %7057 = vmatprep.subr.bf16.mxu0 %v7526_v3 }
 0x5c2   :  { %6274 = vmatmul.mubr.msk.f32.vlgmr.msra.gmra.mrb[56].mxu0 %vm2153_vm7, %v5015_v19  ;;  %6257 = vmatmul.mubr.msk.f32.vlgmr.msra.gmra.mrb[50].mxu1 %vm2153_vm7, %v2150_v20  ;;  %v2253_v19 = vld [vmem:[%s9347_s8 + $0x30] sm:$0xff]  ;;  %v2254_v20 = vld [vmem:[%s9347_s8 + $0x38] sm:$0xff] }
 0x5c3   :  { %6276 = vmatprep.mubr.msk.f32.mxu0 %vm7527_vm0, %v7528_v6  ;;  %6259 = vmatprep.mubr.msk.f32.mxu1 %vm7527_vm0, %v7528_v6 }
 0x5c4   :  { %7029 = vmatpush3.bf16.msra.mxu1 %v7028_v21  ;;  %7059 = vmatpush3.bf16.msra.mxu0 %v7058_v23  ;;  %v7079_v21 = vpack.c.bf16 %v2263_v11, %v2262_v9  ;;  %v2264_v23 = vld [vmem:[%s9348_s9 + $0x30] sm:$0xff]  ;;  %v5077_v9 = vld [vmem:[%s9347_s8 + $0x100] sm:$0xf]  ;;  %v5104_v11 = vld [vmem:[%s9347_s8 + $0x108] sm:$0xff] }
 0x5c5   :  { %7030 = vmatprep.subr.bf16.mxu1 %v7526_v3  ;;  %7060 = vmatprep.subr.bf16.mxu0 %v7526_v3  ;;  %v7082_v10 = vpack.c.bf16 %v2265_v24, %v2264_v23  ;;  %v5108_v24 = vld [vmem:[%s9347_s8 + $0x128] sm:$0xff] }
 0x5c6   :  { %6277 = vmatmul.mubr.msk.f32.gmra.mrb[58].mxu0 %vm2153_vm7, %v5016_v26  ;;  %6260 = vmatmul.mubr.msk.f32.gmra.mrb[52].mxu1 %vm2153_vm7, %v2151_v27  ;;  %v7052_v27 = vpack.c.bf16 %v2254_v20, %v2253_v19  ;;  %v5106_v19 = vld [vmem:[%s9347_s8 + $0x118] sm:$0xff]  ;;  %v5107_v20 = vld [vmem:[%s9347_s8 + $0x120] sm:$0xff] }
 0x5c7   :  { %6279 = vmatprep.mubr.msk.f32.mxu0 %vm7527_vm0, %v7528_v6  ;;  %6262 = vmatprep.mubr.msk.f32.mxu1 %vm7527_vm0, %v7528_v6 }
 0x5c8   :  { %7032 = vmatpush3.bf16.msra.mxu1 %v7031_v7  ;;  %7062 = vmatpush3.bf16.msra.mxu0 %v7061_v28  ;;  %v2255_v7 = vld [vmem:[%s9347_s8 + $0x40] sm:$0xff]  ;;  %v2256_v28 = vld [vmem:[%s9347_s8 + $0x48] sm:$0xff] }
 0x5c9   :  { %7033 = vmatprep.subr.bf16.mxu1 %v7526_v3  ;;  %7063 = vmatprep.subr.bf16.mxu0 %v7526_v3 }
 0x5ca   :  { %6280 = vmatmul.mubr.msk.f32.gmra.mrb[60].mxu0 %vm2153_vm7, %v5017_v30  ;;  %6263 = vmatmul.mubr.msk.f32.gmra.mrb[54].mxu1 %vm2153_vm7, %v2152_v13  ;;  %v2267_v30 = vld [vmem:[%s9348_s9 + $0x48] sm:$0xff]  ;;  %v7055_v13 = vpack.c.bf16 %v2256_v28, %v2255_v7 }
 0x5cb   :  { %6304 = vmatprep.mubr.msk.f32.mxu1 %vm7527_vm0, %v7528_v6  ;;  %6366 = vmatprep.mubr.msk.f32.mxu0 %vm7527_vm0, %v7528_v6 }
 0x5cc   :  { %7035 = vmatpush3.bf16.msra.mxu1 %v7034_v31  ;;  %7065 = vmatpush3.bf16.msra.mxu0 %v7064_v41  ;;  %v7085_v31 = vpack.c.bf16 %v2267_v30, %v2266_v29  ;;  %v5068_v41 = vld [vmem:[%s9347_s8 + $0xb8] sm:$0xff]  ;;  %v5111_v29 = vld [vmem:[%s9347_s8 + $0x140] sm:$0xff]  ;;  %v5097_v30 = vld [vmem:[%s9346_s7 + $0x48] sm:$0xff] }
 0x5cd   :  { %7036 = vmatprep.subr.bf16.mxu1 %v7526_v3  ;;  %7066 = vmatprep.subr.bf16.mxu0 %v7526_v3  ;;  %v7095_v45 = vpack.c.bf16 %v5068_v41, %v5067_v40  ;;  %v5114_v40 = vld [vmem:[%s9347_s8 + $0x158] sm:$0xf]  ;;  %v5123_v41 = vld [vmem:[%s9348_s9 + $0x128] sm:$0xff] }
 0x5ce   :  { %v7153_v43 = vpack.c.bf16 %v5124_v42, %v5123_v41 }
 0x5d0   :  { %7038 = vmatpush3.bf16.msra.mxu1 %v7037_v34  ;;  %7068 = vmatpush3.bf16.msra.mxu0 %v7067_v44  ;;  %v5082_v34 = vld [vmem:[%s9348_s9 + $0xb0] sm:$0xff] }
 0x5d1   :  { %7039 = vmatprep.subr.bf16.mxu1 %v7526_v3  ;;  %7069 = vmatprep.subr.bf16.mxu0 %v7526_v3  ;;  %v7110_v36 = vpack.c.bf16 %v5083_v35, %v5082_v34  ;;  %v5060_v44 = vld [vmem:[%s9346_s7 + $0x30] sm:$0xff]  ;;  %v5112_v34 = vld [vmem:[%s9347_s8 + $0x148] sm:$0xff] }
 0x5d2   :  { %v5113_v35 = vld [vmem:[%s9347_s8 + $0x150] sm:$0xff] }
 0x5d4   :  { %7041 = vmatpush3.bf16.msra.mxu1 %v7040_v37  ;;  %7071 = vmatpush3.bf16.msra.mxu0 %v7070_v47  ;;  %v5084_v37 = vld [vmem:[%s9348_s9 + $0xc0] sm:$0xff] }
 0x5d5   :  { %6302 = vmatprep.subr.mxu1 %v7528_v6  ;;  %6364 = vmatprep.subr.mxu0 %v7528_v6  ;;  %v5069_v47 = vld [vmem:[%s9347_s8 + $0xc0] sm:$0xff] }
 0x5d8   :  { %6303 = vmatpush3.msk.msra.mxu1 %vm2163_vm4, %v5032_v38  ;;  %6365 = vmatpush3.msk.msra.mxu0 %vm2163_vm4, %v5051_v48  ;;  %v5085_v38 = vld [vmem:[%s9348_s9 + $0xc8] sm:$0xff] }
 0x5d9   :  { %7042 = vmatprep.subr.bf16.mxu1 %v7526_v3  ;;  %7072 = vmatprep.subr.bf16.mxu0 %v7526_v3  ;;  %v7113_v39 = vpack.c.bf16 %v5085_v38, %v5084_v37  ;;  %v5070_v48 = vld [vmem:[%s9347_s8 + $0xc8] sm:$0xff]  ;;  %v7144_v38 = vpack.c.bf16 %v5113_v35, %v5112_v34 }
 0x5da   :  { %v7098_v52 = vpack.c.bf16 %v5070_v48, %v5069_v47  ;;  %v5127_v47 = vld [vmem:[%s9348_s9 + $0x148] sm:$0xff]  ;;  %v5128_v48 = vld [vmem:[%s9348_s9 + $0x150] sm:$0xff] }
 0x695   :  { %v2348_v57 = vpop.f32.mrb[56].mxu0  ;;  %v8483_v60 = vpop.f32.mrb[50].mxu1 }
 0x696   :  { %6305 = vmatmul.mubr.msk.f32.vlgmr.msra.gmra.mrb[56].mxu1 %vm2374_vm8, %v2348_v57  ;;  %v6275_v61 = vpop.f32.mrb[57].mxu0  ;;  %6367 = vmatmul.mubr.msk.f32.vlgmr.msra.gmra.mrb[62].mxu0 %vm2374_vm8, %v2348_v57  ;;  %v6258_v62 = vpop.f32.mrb[51].mxu1  ;;  %v7122_v57 = vpack.c.bf16 %v5091_v55, %v5090_v54 }
 0x697   :  { %7044 = vmatpush3.bf16.msra.mxu1 %v7043_v53  ;;  %6307 = vmatprep.mubr.msk.f32.mxu1 %vm7527_vm0, %v7528_v6  ;;  %v7119_v53 = vpack.c.bf16 %v5089_v50, %v5088_v49  ;;  %v5073_v62 = vld [vmem:[%s9347_s8 + $0xe0] sm:$0xff]  ;;  %v7159_v49 = vpack.c.bf16 %v5128_v48, %v5127_v47  ;;  %v5129_v50 = vld [vmem:[%s9348_s9 + $0x158] sm:$0xf] }
 0x698   :  { %7045 = vmatprep.subr.bf16.mxu1 %v7526_v3  ;;  %7074 = vmatpush3.bf16.msra.mxu0 %v7073_v56  ;;  %v5062_v56 = vld [vmem:[%s9346_s7 + $0x40] sm:$0xf] }
 0x699   :  { %v2353_v8 = vpop.f32.mrb[58].mxu0  ;;  %7075 = vmatprep.subr.bf16.mxu0 %v7526_v3  ;;  %v8503_v14 = vpop.f32.mrb[52].mxu1  ;;  %6369 = vmatprep.mubr.msk.f32.mxu0 %vm7527_vm0, %v7528_v6 }
 0x69a   :  { %6308 = vmatmul.mubr.msk.f32.gmra.mrb[58].mxu1 %vm2374_vm8, %v2353_v8  ;;  %v6278_v16 = vpop.f32.mrb[59].mxu0  ;;  %v6261_v17 = vpop.f32.mrb[53].mxu1  ;;  %6370 = vmatmul.mubr.msk.f32.gmra.mrb[64].mxu0 %vm2374_vm8, %v2353_v8 }
 0x69b   :  { %7047 = vmatpush3.bf16.msra.mxu1 %v7046_v63  ;;  %6310 = vmatprep.mubr.msk.f32.mxu1 %vm7527_vm0, %v7528_v6  ;;  %v5074_v63 = vld [vmem:[%s9347_s8 + $0xe8] sm:$0xff] }
 0x69c   :  { %7048 = vmatprep.subr.bf16.mxu1 %v7526_v3  ;;  %7077 = vmatpush3.bf16.msra.mxu0 %v7076_v5  ;;  %v7104_v0 = vpack.c.bf16 %v5074_v63, %v5073_v62  ;;  %v5076_v5 = vld [vmem:[%s9347_s8 + $0xf8] sm:$0xff] }
 0x69d   :  { %v2358_v22 = vpop.f32.mrb[60].mxu0  ;;  %7078 = vmatprep.subr.bf16.mxu0 %v7526_v3  ;;  %v8525_v25 = vpop.f32.mrb[54].mxu1  ;;  %6372 = vmatprep.mubr.msk.f32.mxu0 %vm7527_vm0, %v7528_v6  ;;  %v7107_v8 = vpack.c.bf16 %v5076_v5, %v5075_v1  ;;  %v5143_v5 = vld [vmem:[%s9347_s8 + $0x170] sm:$0xff] }
 0x69e   :  { %6311 = vmatmul.mubr.msk.f32.gmra.mrb[60].mxu1 %vm2374_vm8, %v2358_v22  ;;  %v6281_v4 = vpop.f32.mrb[61].mxu0  ;;  %6373 = vmatmul.mubr.msk.f32.gmra.mrb[66].mxu0 %vm2374_vm8, %v2358_v22  ;;  %v6264_v26 = vpop.f32.mrb[55].mxu1  ;;  %v7135_v22 = vpack.c.bf16 %v5107_v20, %v5106_v19  ;;  %v5146_v19 = vld [vmem:[%s9347_s8 + $0x188] sm:$0xff] }
 0x69f   :  { %7050 = vmatpush3.bf16.msra.mxu1 %v7049_v18  ;;  %6335 = vmatprep.mubr.msk.f32.mxu1 %vm7527_vm0, %v7528_v6  ;;  %v5119_v4 = vld [vmem:[%s9348_s9 + $0x108] sm:$0xff]  ;;  %v5120_v26 = vld [vmem:[%s9348_s9 + $0x110] sm:$0xff] }
 0x6a0   :  { %7051 = vmatprep.subr.bf16.mxu1 %v7526_v3  ;;  %7080 = vmatpush3.bf16.msra.mxu0 %v7079_v21 }
 0x6a1   :  { %7081 = vmatprep.subr.bf16.mxu0 %v7526_v3  ;;  %6397 = vmatprep.mubr.msk.f32.mxu0 %vm7527_vm0, %v7528_v6 }
 0x6a3   :  { %7053 = vmatpush3.bf16.msra.mxu1 %v7052_v27 }
 0x6a4   :  { %7054 = vmatprep.subr.bf16.mxu1 %v7526_v3  ;;  %7083 = vmatpush3.bf16.msra.mxu0 %v7082_v10  ;;  %v5110_v10 = vld [vmem:[%s9347_s8 + $0x138] sm:$0xff] }
 0x6a5   :  { %7084 = vmatprep.subr.bf16.mxu0 %v7526_v3 }
 0x6a7   :  { %7056 = vmatpush3.bf16.msra.mxu1 %v7055_v13  ;;  %v7147_v13 = vpack.c.bf16 %v5120_v26, %v5119_v4  ;;  %v5148_v4 = vld [vmem:[%s9347_s8 + $0x198] sm:$0xff] }
 0x6a8   :  { %6333 = vmatprep.subr.mxu1 %v7528_v6  ;;  %7086 = vmatpush3.bf16.msra.mxu0 %v7085_v31  ;;  %v5121_v31 = vld [vmem:[%s9348_s9 + $0x118] sm:$0xff] }
 0x6a9   :  { %6395 = vmatprep.subr.mxu0 %v7528_v6 }
 0x6ab   :  { %6334 = vmatpush3.msk.msra.mxu1 %vm2163_vm4, %v2257_v32  ;;  %v5122_v32 = vld [vmem:[%s9348_s9 + $0x120] sm:$0xff] }
 0x6ac   :  { %6336 = vmatmul.mubr.msk.f32.vlgmr.msra.gmra.mrb[56].mxu1 %vm2374_vm8, %v8483_v60  ;;  %7087 = vmatprep.subr.bf16.mxu1 %v7526_v3  ;;  %v7150_v37 = vpack.c.bf16 %v5122_v32, %v5121_v31 }
 0x6ad   :  { %7089 = vmatpush3.bf16.msra.mxu1 %v8321_v2  ;;  %6338 = vmatprep.mubr.msk.f32.mxu1 %vm7527_vm0, %v7528_v6 }
 0x6ae   :  { %7090 = vmatprep.subr.bf16.mxu1 %v7526_v3  ;;  %6396 = vmatpush3.msk.msra.mxu0 %vm2163_vm4, %v2268_v33  ;;  %v7141_v33 = vpack.c.bf16 %v5111_v29, %v5110_v10  ;;  %v5151_v29 = vld [vmem:[%s9347_s8 + $0x1b0] sm:$0xf] }
 0x6af   :  { %6398 = vmatmul.mubr.msk.f32.vlgmr.msra.gmra.mrb[62].mxu0 %vm2374_vm8, %v8483_v60  ;;  %7109 = vmatprep.subr.bf16.mxu0 %v7526_v3  ;;  %v5072_v60 = vld [vmem:[%s9347_s8 + $0xd8] sm:$0xff] }
 0x6b0   :  { %6339 = vmatmul.mubr.msk.f32.gmra.mrb[58].mxu1 %vm2374_vm8, %v8503_v14  ;;  %6400 = vmatprep.mubr.msk.f32.mxu0 %vm7527_vm0, %v7528_v6  ;;  %v7101_v61 = vpack.c.bf16 %v5072_v60, %v5071_v59  ;;  %v5141_v60 = vld [vmem:[%s9347_s8 + $0x160] sm:$0xff] }
 0x6b1   :  { %7093 = vmatpush3.bf16.msk.msra.mxu1 %vm8329_vm6, %v8336_v15  ;;  %6341 = vmatprep.mubr.msk.f32.mxu1 %vm7527_vm0, %v7528_v6 }
 0x6b2   :  { %7111 = vmatpush3.bf16.msra.mxu0 %v7110_v36  ;;  %7094 = vmatprep.subr.bf16.mxu1 %v7526_v3  ;;  %v5098_v36 = vld [vmem:[%s9346_s7 + $0x50] sm:$0xff] }
 0x6b3   :  { %6401 = vmatmul.mubr.msk.f32.gmra.mrb[64].mxu0 %vm2374_vm8, %v8503_v14  ;;  %7112 = vmatprep.subr.bf16.mxu0 %v7526_v3  ;;  %v5105_v14 = vld [vmem:[%s9347_s8 + $0x110] sm:$0xff] }
 0x6b4   :  { %6342 = vmatmul.mubr.msk.f32.gmra.mrb[60].mxu1 %vm2374_vm8, %v8525_v25  ;;  %6403 = vmatprep.mubr.msk.f32.mxu0 %vm7527_vm0, %v7528_v6  ;;  %v7132_v17 = vpack.c.bf16 %v5105_v14, %v5104_v11  ;;  %v5162_v11 = vld [vmem:[%s9348_s9 + $0x190] sm:$0xff]  ;;  %v5163_v14 = vld [vmem:[%s9348_s9 + $0x198] sm:$0xff] }
 0x6b5   :  { %6414 = vmatprep.mubr.msk.f32.mxu1 %vm7527_vm0, %v7528_v6  ;;  %v7193_v20 = vpack.c.bf16 %v5163_v14, %v5162_v11  ;;  %v5180_v14 = vld [vmem:[%s9352_s13 + $0x2] sm:$0x3] }
 0x6b6   :  { %7114 = vmatpush3.bf16.msra.mxu0 %v7113_v39  ;;  %v5099_v39 = vld [vmem:[%s9346_s7 + $0x58] sm:$0xf] }
 0x6b7   :  { %6404 = vmatmul.mubr.msk.f32.gmra.mrb[66].mxu0 %vm2374_vm8, %v8525_v25  ;;  %7115 = vmatprep.subr.bf16.mxu0 %v7526_v3  ;;  %v5109_v25 = vld [vmem:[%s9347_s8 + $0x130] sm:$0xff] }
 0x6b8   :  { %6415 = vmatmul.mubr.msk.f32.vlgmr.msra.gmra.mrb[62].mxu1 %vm2153_vm7, %v5060_v44  ;;  %6476 = vmatprep.mubr.msk.f32.mxu0 %vm7527_vm0, %v7528_v6  ;;  %v7138_v7 = vpack.c.bf16 %v5109_v25, %v5108_v24  ;;  %v5125_v44 = vld [vmem:[%s9348_s9 + $0x138] sm:$0xff]  ;;  %v5147_v25 = vld [vmem:[%s9347_s8 + $0x190] sm:$0xff] }
 0x6b9   :  { %6417 = vmatprep.mubr.msk.f32.mxu1 %vm7527_vm0, %v7528_v6  ;;  %7096 = vmatpush3.bf16.msra.mxu1 %v7095_v45  ;;  %v5126_v45 = vld [vmem:[%s9348_s9 + $0x140] sm:$0xff] }
 0x6ba   :  { %7117 = vmatpush3.bf16.msra.mxu0 %v7116_v46  ;;  %7097 = vmatprep.subr.bf16.mxu1 %v7526_v3  ;;  %v7156_v46 = vpack.c.bf16 %v5126_v45, %v5125_v44 }
 0x6bb   :  { %7118 = vmatprep.subr.bf16.mxu0 %v7526_v3 }
 0x6bc   :  { %6418 = vmatmul.mubr.msk.f32.gmra.mrb[64].mxu1 %vm2153_vm7, %v5061_v51  ;;  %v5156_v51 = vld [vmem:[%s9348_s9 + $0x160] sm:$0xff] }
 0x6bd   :  { %6420 = vmatprep.mubr.msk.f32.mxu1 %vm7527_vm0, %v7528_v6  ;;  %7099 = vmatpush3.bf16.msra.mxu1 %v7098_v52  ;;  %v5157_v52 = vld [vmem:[%s9348_s9 + $0x168] sm:$0xff] }
 0x6be   :  { %7120 = vmatpush3.bf16.msra.mxu0 %v7119_v53  ;;  %7100 = vmatprep.subr.bf16.mxu1 %v7526_v3  ;;  %v7184_v54 = vpack.c.bf16 %v5157_v52, %v5156_v51 }
 0x6bf   :  { %7121 = vmatprep.subr.bf16.mxu0 %v7526_v3 }
 0x6c0   :  { %6421 = vmatmul.mubr.msk.f32.gmra.mrb[66].mxu1 %vm2153_vm7, %v5062_v56  ;;  %v5158_v56 = vld [vmem:[%s9348_s9 + $0x170] sm:$0xff] }
 0x6c1   :  { %6445 = vmatprep.mubr.msk.f32.mxu1 %vm7527_vm0, %v7528_v6  ;;  %7102 = vmatpush3.bf16.msra.mxu1 %v7101_v61  ;;  %v5142_v61 = vld [vmem:[%s9347_s8 + $0x168] sm:$0xff] }
 0x6c2   :  { %7123 = vmatpush3.bf16.msra.mxu0 %v7122_v57  ;;  %7103 = vmatprep.subr.bf16.mxu1 %v7526_v3  ;;  %v5159_v57 = vld [vmem:[%s9348_s9 + $0x178] sm:$0xff]  ;;  %v7169_v1 = vpack.c.bf16 %v5142_v61, %v5141_v60  ;;  %v3648_v60 = vld [vmem:[%s9350_s11 + $0x8] sm:$0x3] }
 0x6c3   :  { %6474 = vmatprep.subr.mxu0 %v7528_v6  ;;  %v7187_v59 = vpack.c.bf16 %v5159_v57, %v5158_v56  ;;  %v3735_v61 = vld [vmem:[%s9351_s12 + $0x8] sm:$0x3] }
 0x6c5   :  { %7105 = vmatpush3.bf16.msra.mxu1 %v7104_v0  ;;  %v5134_v0 = vld [vmem:[%s9346_s7 + $0x60] sm:$0xff] }
 0x6c6   :  { %6475 = vmatpush3.msk.msra.mxu0 %vm2163_vm4, %v5092_v58  ;;  %7106 = vmatprep.subr.bf16.mxu1 %v7526_v3 }
 0x6c7   :  { %7124 = vmatprep.subr.bf16.mxu0 %v7526_v3 }
 0x6c9   :  { %7108 = vmatpush3.bf16.msra.mxu1 %v7107_v8  ;;  %v5144_v8 = vld [vmem:[%s9347_s8 + $0x178] sm:$0xff] }
 0x6ca   :  { %6443 = vmatprep.subr.mxu1 %v7528_v6 }
 0x6cd   :  { %6444 = vmatpush3.msk.msra.mxu1 %vm2163_vm4, %v5077_v9 }
 0x6ce   :  { %7131 = vmatprep.subr.bf16.mxu1 %v7526_v3 }
 0x78b   :  { %v2816_v16 = vpop.f32.mrb[62].mxu1 }
 0x78c   :  { %6477 = vmatmul.mubr.msk.f32.vlgmr.msra.gmra.mrb[62].mxu0 %vm2374_vm8, %v2816_v16  ;;  %v6416_v18 = vpop.f32.mrb[63].mxu1  ;;  %6446 = vmatmul.mubr.msk.f32.vlgmr.msra.gmra.mrb[56].mxu1 %vm2374_vm8, %v2816_v16  ;;  %v5135_v16 = vld [vmem:[%s9346_s7 + $0x68] sm:$0xff] }
 0x78d   :  { %7126 = vmatpush3.bf16.msra.mxu0 %v8321_v2  ;;  %6479 = vmatprep.mubr.msk.f32.mxu0 %vm7527_vm0, %v7528_v6  ;;  %v5145_v18 = vld [vmem:[%s9347_s8 + $0x180] sm:$0xff] }
 0x78e   :  { %7127 = vmatprep.subr.bf16.mxu0 %v7526_v3  ;;  %6448 = vmatprep.mubr.msk.f32.mxu1 %vm7527_vm0, %v7528_v6  ;;  %v7175_v24 = vpack.c.bf16 %v5146_v19, %v5145_v18  ;;  %v5185_v18 = vld [vmem:[%s9353_s14 + $0x60] sm:$0xff]  ;;  %v5186_v19 = vld [vmem:[%s9353_s14 + $0x68] sm:$0xff] }
 0x78f   :  { %v2821_v21 = vpop.f32.mrb[64].mxu1  ;;  %7133 = vmatpush3.bf16.msra.mxu1 %v7132_v17  ;;  %v7172_v17 = vpack.c.bf16 %v5144_v8, %v5143_v5  ;;  %v5183_v8 = vld [vmem:[%s9353_s14 + $0x50] sm:$0xff] }
 0x790   :  { %6480 = vmatmul.mubr.msk.f32.gmra.mrb[64].mxu0 %vm2374_vm8, %v2821_v21  ;;  %v6419_v23 = vpop.f32.mrb[65].mxu1  ;;  %6449 = vmatmul.mubr.msk.f32.gmra.mrb[58].mxu1 %vm2374_vm8, %v2821_v21  ;;  %v5164_v21 = vld [vmem:[%s9348_s9 + $0x1a0] sm:$0xff] }
 0x791   :  { %7130 = vmatpush3.bf16.msk.msra.mxu0 %vm8329_vm6, %v8336_v15  ;;  %6482 = vmatprep.mubr.msk.f32.mxu0 %vm7527_vm0, %v7528_v6  ;;  %v5136_v23 = vld [vmem:[%s9346_s7 + $0x70] sm:$0xf] }
 0x792   :  { %6451 = vmatprep.mubr.msk.f32.mxu1 %vm7527_vm0, %v7528_v6  ;;  %7134 = vmatprep.subr.bf16.mxu1 %v7526_v3 }
 0x793   :  { %v2826_v27 = vpop.f32.mrb[66].mxu1  ;;  %7136 = vmatpush3.bf16.msra.mxu1 %v7135_v22  ;;  %7146 = vmatprep.subr.bf16.mxu0 %v7526_v3  ;;  %v5165_v22 = vld [vmem:[%s9348_s9 + $0x1a8] sm:$0xff] }
 0x794   :  { %6483 = vmatmul.mubr.msk.f32.gmra.mrb[66].mxu0 %vm2374_vm8, %v2826_v27  ;;  %v6422_v28 = vpop.f32.mrb[67].mxu1  ;;  %6452 = vmatmul.mubr.msk.f32.gmra.mrb[60].mxu1 %vm2374_vm8, %v2826_v27  ;;  %v7196_v26 = vpack.c.bf16 %v5165_v22, %v5164_v21  ;;  %v7178_v27 = vpack.c.bf16 %v5148_v4, %v5147_v25  ;;  %v5187_v21 = vld [vmem:[%s9353_s14 + $0x70] sm:$0xff]  ;;  %v5188_v22 = vld [vmem:[%s9353_s14 + $0x78] sm:$0xff]  ;;  %v5190_v25 = vld [vmem:[%s9353_s14 + $0x88] sm:$0xff] }
 0x795   :  { %6493 = vmatprep.mubr.msk.f32.mxu0 %vm7527_vm0, %v7528_v6  ;;  %7137 = vmatprep.subr.bf16.mxu1 %v7526_v3  ;;  %v5150_v28 = vld [vmem:[%s9347_s8 + $0x1a8] sm:$0xff] }
 0x796   :  { %6524 = vmatprep.mubr.msk.f32.mxu1 %vm7527_vm0, %v7528_v6 }
 0x797   :  { %7139 = vmatpush3.bf16.msra.mxu1 %v7138_v7  ;;  %v5149_v7 = vld [vmem:[%s9347_s8 + $0x1a0] sm:$0xff] }
 0x798   :  { %6494 = vmatmul.mubr.msk.f32.vlgmr.msra.gmra.mrb[68].mxu0 %vm2153_vm7, %v5097_v30  ;;  %7140 = vmatprep.subr.bf16.mxu1 %v7526_v3  ;;  %v7181_v10 = vpack.c.bf16 %v5150_v28, %v5149_v7  ;;  %v5166_v30 = vld [vmem:[%s9348_s9 + $0x1b0] sm:$0xf]  ;;  %v3898_v28 = vld [vmem:[%s9353_s14] sm:$0xff] }
 0x799   :  { %6496 = vmatprep.mubr.msk.f32.mxu0 %vm7527_vm0, %v7528_v6  ;;  %7148 = vmatpush3.bf16.msra.mxu0 %v7147_v13 }
 0x79a   :  { %7149 = vmatprep.subr.bf16.mxu0 %v7526_v3 }
 0x79b   :  { %7142 = vmatpush3.bf16.msra.mxu1 %v7141_v33 }
 0x79c   :  { %6497 = vmatmul.mubr.msk.f32.gmra.mrb[70].mxu0 %vm2153_vm7, %v5098_v36  ;;  %7143 = vmatprep.subr.bf16.mxu1 %v7526_v3  ;;  %v3647_v36 = vld [vmem:[%s9350_s11] sm:$0xff]  ;;  %s7530_s11 = smov [#allocation2]  }
 0x79d   :  { %6499 = vmatprep.mubr.msk.f32.mxu0 %vm7527_vm0, %v7528_v6  ;;  %7151 = vmatpush3.bf16.msra.mxu0 %v7150_v37  ;;  %v3734_v37 = vld [vmem:[%s9351_s12] sm:$0xff]  ;;  %s4829_s12 = sshll.u32 %s7530_s11, 4  ;;  %s4830_s12 = int_to_ptr.vmem [resolvable:$true] %s4829_s12 }
 0x79e   :  { %7152 = vmatprep.subr.bf16.mxu0 %v7526_v3  ;;  %p7507_p1 = scmp.lt.s32.totalorder %s4830_s12, %s4830_s12 }
 0x79f   :  { %7145 = vmatpush3.bf16.msra.mxu1 %v7144_v38 }
 0x7a0   :  { %6500 = vmatmul.mubr.msk.f32.gmra.mrb[72].mxu0 %vm2153_vm7, %v5099_v39  ;;  %6522 = vmatprep.subr.mxu1 %v7528_v6 }
 0x7a1   :  { %6555 = vmatprep.mubr.msk.f32.mxu0 %vm7527_vm0, %v7528_v6  ;;  %7154 = vmatpush3.bf16.msra.mxu0 %v7153_v43  ;;  %v5171_v43 = vld [vmem:[%s9349_s10] ss:$0 sm:$0xff] }
 0x7a2   :  { %7155 = vmatprep.subr.bf16.mxu0 %v7526_v3 }
 0x7a3   :  { %6523 = vmatpush3.msk.msra.mxu1 %vm2163_vm4, %v5114_v40 }
 0x7a4   :  { %7161 = vmatprep.subr.bf16.mxu1 %v7526_v3 }
 0x7a5   :  { %7157 = vmatpush3.bf16.msra.mxu0 %v7156_v46 }
 0x7a6   :  { %7158 = vmatprep.subr.bf16.mxu0 %v7526_v3 }
 0x7a9   :  { %7160 = vmatpush3.bf16.msra.mxu0 %v7159_v49 }
 0x7aa   :  { %6553 = vmatprep.subr.mxu0 %v7528_v6 }
 0x7ad   :  { %6554 = vmatpush3.msk.msra.mxu0 %vm2163_vm4, %v5129_v50 }
 0x7ae   :  { %7183 = vmatprep.subr.bf16.mxu0 %v7526_v3 }
 0x86b   :  { %v3114_v53 = vpop.f32.mrb[68].mxu0 }
 0x86c   :  { %6525 = vmatmul.mubr.msk.f32.vlgmr.msra.gmra.mrb[56].mxu1 %vm2374_vm8, %v3114_v53  ;;  %v6495_v55 = vpop.f32.mrb[69].mxu0  ;;  %6556 = vmatmul.mubr.msk.f32.vlgmr.msra.gmra.mrb[62].mxu0 %vm2374_vm8, %v3114_v53 }
 0x86d   :  { %7163 = vmatpush3.bf16.msra.mxu1 %v8321_v2  ;;  %6527 = vmatprep.mubr.msk.f32.mxu1 %vm7527_vm0, %v7528_v6 }
 0x86e   :  { %7164 = vmatprep.subr.bf16.mxu1 %v7526_v3  ;;  %6558 = vmatprep.mubr.msk.f32.mxu0 %vm7527_vm0, %v7528_v6 }
 0x86f   :  { %v3119_v58 = vpop.f32.mrb[70].mxu0  ;;  %7185 = vmatpush3.bf16.msra.mxu0 %v7184_v54 }
 0x870   :  { %6528 = vmatmul.mubr.msk.f32.gmra.mrb[58].mxu1 %vm2374_vm8, %v3119_v58  ;;  %v6498_v2 = vpop.f32.mrb[71].mxu0  ;;  %6559 = vmatmul.mubr.msk.f32.gmra.mrb[64].mxu0 %vm2374_vm8, %v3119_v58 }
 0x871   :  { %7167 = vmatpush3.bf16.msk.msra.mxu1 %vm8329_vm6, %v8336_v15  ;;  %6530 = vmatprep.mubr.msk.f32.mxu1 %vm7527_vm0, %v7528_v6  ;;  %v5161_v15 = vld [vmem:[%s9348_s9 + $0x188] sm:$0xff] }
 0x872   :  { %6561 = vmatprep.mubr.msk.f32.mxu0 %vm7527_vm0, %v7528_v6  ;;  %7168 = vmatprep.subr.bf16.mxu1 %v7526_v3  ;;  %v7190_v9 = vpack.c.bf16 %v5161_v15, %v5160_v12 }
 0x873   :  { %v3124_v62 = vpop.f32.mrb[72].mxu0  ;;  %7186 = vmatprep.subr.bf16.mxu0 %v7526_v3 }
 0x874   :  { %6531 = vmatmul.mubr.msk.f32.gmra.mrb[60].mxu1 %vm2374_vm8, %v3124_v62  ;;  %v6501_v63 = vpop.f32.mrb[73].mxu0  ;;  %6562 = vmatmul.mubr.msk.f32.gmra.mrb[66].mxu0 %vm2374_vm8, %v3124_v62 }
 0x875   :  { %6572 = vmatprep.mubr.msk.f32.mxu1 %vm7527_vm0, %v7528_v6  ;;  %7188 = vmatpush3.bf16.msra.mxu0 %v7187_v59 }
 0x876   :  { %7189 = vmatprep.subr.bf16.mxu0 %v7526_v3  ;;  %6634 = vmatprep.mubr.msk.f32.mxu0 %vm7527_vm0, %v7528_v6 }
 0x878   :  { %6573 = vmatmul.mubr.msk.f32.vlgmr.msra.gmra.mrb[68].mxu1 %vm2153_vm7, %v5134_v0 }
 0x879   :  { %6575 = vmatprep.mubr.msk.f32.mxu1 %vm7527_vm0, %v7528_v6  ;;  %7170 = vmatpush3.bf16.msra.mxu1 %v7169_v1 }
 0x87a   :  { %7171 = vmatprep.subr.bf16.mxu1 %v7526_v3  ;;  %7191 = vmatpush3.bf16.msra.mxu0 %v7190_v9  ;;  %v5184_v9 = vld [vmem:[%s9353_s14 + $0x58] sm:$0xff] }
 0x87b   :  { %7192 = vmatprep.subr.bf16.mxu0 %v7526_v3 }
 0x87c   :  { %6576 = vmatmul.mubr.msk.f32.gmra.mrb[70].mxu1 %vm2153_vm7, %v5135_v16  ;;  %v3819_v16 = vld [vmem:[%s9352_s13] sm:$0x3] }
 0x87d   :  { %6578 = vmatprep.mubr.msk.f32.mxu1 %vm7527_vm0, %v7528_v6  ;;  %7173 = vmatpush3.bf16.msra.mxu1 %v7172_v17  ;;  %v7215_v17 = vpack.c.bf16 %v5184_v9, %v5183_v8 }
 0x87e   :  { %7174 = vmatprep.subr.bf16.mxu1 %v7526_v3  ;;  %7194 = vmatpush3.bf16.msra.mxu0 %v7193_v20  ;;  %v7218_v20 = vpack.c.bf16 %v5186_v19, %v5185_v18  ;;  %v5220_v18 = vld [vmem:[%s9353_s14 + $0x130] sm:$0xff]  ;;  %v5221_v19 = vld [vmem:[%s9353_s14 + $0x138] sm:$0xff] }
 0x87f   :  { %7195 = vmatprep.subr.bf16.mxu0 %v7526_v3 }
 0x880   :  { %6579 = vmatmul.mubr.msk.f32.gmra.mrb[72].mxu1 %vm2153_vm7, %v5136_v23  ;;  %v7221_v23 = vpack.c.bf16 %v5188_v22, %v5187_v21 }
 0x881   :  { %7176 = vmatpush3.bf16.msra.mxu1 %v7175_v24  ;;  %6603 = vmatprep.mubr.msk.f32.mxu1 %vm7527_vm0, %v7528_v6  ;;  %v5189_v24 = vld [vmem:[%s9353_s14 + $0x80] sm:$0xff] }
 0x882   :  { %7177 = vmatprep.subr.bf16.mxu1 %v7526_v3  ;;  %7197 = vmatpush3.bf16.msra.mxu0 %v7196_v26  ;;  %v7224_v4 = vpack.c.bf16 %v5190_v25, %v5189_v24  ;;  %v5191_v26 = vld [vmem:[%s9353_s14 + $0x90] sm:$0xff] }
 0x883   :  { %6632 = vmatprep.subr.mxu0 %v7528_v6 }
 0x885   :  { %7179 = vmatpush3.bf16.msra.mxu1 %v7178_v27  ;;  %v5192_v27 = vld [vmem:[%s9353_s14 + $0x98] sm:$0xff] }
 0x886   :  { %7180 = vmatprep.subr.bf16.mxu1 %v7526_v3  ;;  %6633 = vmatpush3.msk.msra.mxu0 %vm2163_vm4, %v5166_v30  ;;  %v7227_v7 = vpack.c.bf16 %v5192_v27, %v5191_v26  ;;  %v3900_v30 = vld [vmem:[%s9353_s14 + $0x10] sm:$0xff]  ;;  %v5227_v26 = vld [vmem:[%s9353_s14 + $0x148] sm:$0xff] }
 0x889   :  { %7182 = vmatpush3.bf16.msra.mxu1 %v7181_v10  ;;  %v3899_v10 = vld [vmem:[%s9353_s14 + $0x8] sm:$0xff] }
 0x88a   :  { %6601 = vmatprep.subr.mxu1 %v7528_v6 }
 0x88d   :  { %6602 = vmatpush3.msk.msra.mxu1 %vm2163_vm4, %v5151_v29  ;;  %v7230_v29 = vpack.c.bf16 %v3899_v10, %v3898_v28  ;;  %v5223_v28 = vld [vmem:[%s9352_s13 + $0x8] sm:$0x3] }
 0x94b   :  { %v3412_v13 = vpop.f32.mrb[68].mxu1 }
 0x94c   :  { %6604 = vmatmul.mubr.msk.f32.vlgmr.msra.gmra.mrb[56].mxu1 %vm2374_vm8, %v3412_v13  ;;  %6635 = vmatmul.mubr.msk.f32.vlgmr.msra.gmra.mrb[62].mxu0 %vm2374_vm8, %v3412_v13  ;;  %v6574_v31 = vpop.f32.mrb[69].mxu1  ;;  %v3901_v13 = vld [vmem:[%s9353_s14 + $0x18] sm:$0xff] }
 0x94d   :  { %6606 = vmatprep.mubr.msk.f32.mxu1 %vm7527_vm0, %v7528_v6  ;;  %6637 = vmatprep.mubr.msk.f32.mxu0 %vm7527_vm0, %v7528_v6  ;;  %v7233_v31 = vpack.c.bf16 %v3901_v13, %v3900_v30  ;;  %v5229_v30 = vld [vmem:[%s9353_s14 + $0x158] sm:$0xff] }
 0x94f   :  { %v3417_v32 = vpop.f32.mrb[70].mxu1 }
 0x950   :  { %6607 = vmatmul.mubr.msk.f32.gmra.mrb[58].mxu1 %vm2374_vm8, %v3417_v32  ;;  %6638 = vmatmul.mubr.msk.f32.gmra.mrb[64].mxu0 %vm2374_vm8, %v3417_v32  ;;  %v6577_v33 = vpop.f32.mrb[71].mxu1  ;;  %v3902_v32 = vld [vmem:[%s9353_s14 + $0x20] sm:$0xff] }
 0x951   :  { %6609 = vmatprep.mubr.msk.f32.mxu1 %vm7527_vm0, %v7528_v6  ;;  %6640 = vmatprep.mubr.msk.f32.mxu0 %vm7527_vm0, %v7528_v6  ;;  %v3903_v33 = vld [vmem:[%s9353_s14 + $0x28] sm:$0xff] }
 0x953   :  { %v3422_v34 = vpop.f32.mrb[72].mxu1 }
 0x954   :  { %6610 = vmatmul.mubr.msk.f32.gmra.mrb[60].mxu1 %vm2374_vm8, %v3422_v34  ;;  %6641 = vmatmul.mubr.msk.f32.gmra.mrb[66].mxu0 %vm2374_vm8, %v3422_v34  ;;  %v6580_v35 = vpop.f32.mrb[73].mxu1  ;;  %v7236_v34 = vpack.c.bf16 %v3903_v33, %v3902_v32  ;;  %v5231_v32 = vld [vmem:[%s9353_s14 + $0x168] sm:$0xff] }
 0x955   :  { %6649 = vmatprep.mubr.msk.f32.mxu1 %vm3649_vm9, %v3647_v36  ;;  %6658 = vmatprep.mubr.msk.f32.mxu0 %vm3649_vm9, %v3734_v37  ;;  %v3904_v35 = vld [vmem:[%s9353_s14 + $0x30] sm:$0xff]  ;;  %v3905_v36 = vld [vmem:[%s9353_s14 + $0x38] sm:$0xff] }
 0x956   :  { %v7239_v37 = vpack.c.bf16 %v3905_v36, %v3904_v35  ;;  %v5233_v35 = vld [vmem:[%s9353_s14 + $0x178] sm:$0xff] }
 0xa1f   :  { %v3516_v38 = vpop.f32.mrb[56].mxu1  ;;  %v3614_v39 = vpop.f32.mrb[62].mxu0 }
 0xa20   :  { %v3631_v40 = vmax.f32 %v3516_v38, %v3614_v39  ;;  %v6605_v41 = vpop.f32.mrb[57].mxu1  ;;  %v6636_v42 = vpop.f32.mrb[63].mxu0  ;;  %v3906_v38 = vld [vmem:[%s9353_s14 + $0x40] sm:$0xff]  ;;  %v3907_v39 = vld [vmem:[%s9353_s14 + $0x48] sm:$0xff] }
 0xa21   :  { %v5198_v41 = vld [vmem:[%s9353_s14 + $0xa0] sm:$0xff]  ;;  %v5199_v42 = vld [vmem:[%s9353_s14 + $0xa8] sm:$0xff] }
 0xa22   :  { %v3641_v46 = vadd.f32 %v5171_v43, %v3631_v40  ;;  %v7242_v40 = vpack.c.bf16 %v3907_v39, %v3906_v38  ;;  %v5235_v38 = vld [vmem:[%s9353_s14 + $0x188] sm:$0xff] }
 0xa23   :  { %v3521_v44 = vpop.f32.mrb[58].mxu1  ;;  %v3619_v45 = vpop.f32.mrb[64].mxu0 }
 0xa24   :  { %v3632_v47 = vmax.f32 %v3521_v44, %v3619_v45  ;;  %v6608_v48 = vpop.f32.mrb[59].mxu1  ;;  %v6639_v49 = vpop.f32.mrb[65].mxu0  ;;  %v3644_v53 = vmax.f32 %v3641_v46, 0.0  ;;  %v5200_v46 = vld [vmem:[%s9353_s14 + $0xb0] sm:$0xff] }
 0xa26   :  { %v3642_v50 = vadd.f32 %v5171_v43, %v3632_v47  ;;  %v5201_v47 = vld [vmem:[%s9353_s14 + $0xb8] sm:$0xff] }
 0xa27   :  { %v3526_v51 = vpop.f32.mrb[60].mxu1  ;;  %v3624_v52 = vpop.f32.mrb[66].mxu0 }
 0xa28   :  { %v3645_v54 = vmax.f32 %v3642_v50, 0.0  ;;  %v3633_v55 = vmax.f32 %v3526_v51, %v3624_v52  ;;  %v6611_v56 = vpop.f32.mrb[61].mxu1  ;;  %v6642_v57 = vpop.f32.mrb[67].mxu0  ;;  %v5195_v50 = vld [vmem:[%s9352_s13 + $0x4] sm:$0x3]  ;;  %v7252_v51 = vpack.c.bf16 %v5201_v47, %v5200_v46  ;;  %v5212_v52 = vld [vmem:[%s9353_s14 + $0xf0] sm:$0xff] }
 0xa29   :  { %v5209_v56 = vld [vmem:[%s9352_s13 + $0x6] sm:$0x3]  ;;  %v4635_v47 = vld [vmem:[%s9355_s16 + $0x28] sm:$0xff] }
 0xa2a   :  { %v7198_v58 = vpack.c.bf16 %v3645_v54, %v3644_v53  ;;  %v3643_v2 = vadd.f32 %v5171_v43, %v3633_v55  ;;  %v7249_v43 = vpack.c.bf16 %v5199_v42, %v5198_v41  ;;  %v5213_v53 = vld [vmem:[%s9353_s14 + $0xf8] sm:$0xff]  ;;  %v5202_v54 = vld [vmem:[%s9353_s14 + $0xc0] sm:$0xff]  ;;  %v5203_v55 = vld [vmem:[%s9353_s14 + $0xc8] sm:$0xff] }
 0xa2b   :  { %v7268_v57 = vpack.c.bf16 %v5213_v53, %v5212_v52  ;;  %v4631_v41 = vld [vmem:[%s9355_s16 + $0x8] sm:$0xff]  ;;  %v4632_v42 = vld [vmem:[%s9355_s16 + $0x10] sm:$0xff]  ;;  %v4634_v46 = vld [vmem:[%s9355_s16 + $0x20] sm:$0xff] }
 0xa2c   :  { %v3646_v59 = vmax.f32 %v3643_v2, 0.0  ;;  %7199 = vmatprep.subr.bf16.mxu1 %v7198_v58  ;;  %7203 = vmatprep.subr.bf16.mxu0 %v7198_v58  ;;  %v5214_v2 = vld [vmem:[%s9353_s14 + $0x100] sm:$0xff]  ;;  %v4639_v53 = vld [vmem:[%s9355_s16 + $0x48] sm:$0xff] }
 0xa2d   :  { %7201 = vmatpush3.bf16.msra.mxu1 %v7198_v58  ;;  %7205 = vmatpush3.bf16.msra.mxu0 %v7198_v58  ;;  %v7255_v58 = vpack.c.bf16 %v5203_v55, %v5202_v54  ;;  %v4638_v52 = vld [vmem:[%s9355_s16 + $0x40] sm:$0xff]  ;;  %v4640_v55 = vld [vmem:[%s9355_s16 + $0x50] sm:$0xff] }
 0xa2e   :  { %6647 = vmatprep.subr.msk.mxu1 %vm2163_vm4, %v3646_v59  ;;  %6656 = vmatprep.subr.msk.mxu0 %vm2163_vm4, %v3646_v59  ;;  %v7314_v54 = vpack.c.bf16 %v4639_v53, %v4638_v52 }
 0xa31   :  { %6648 = vmatpush3.msk.msra.mxu1 %vm2163_vm4, %v3646_v59  ;;  %6657 = vmatpush3.msk.msra.mxu0 %vm2163_vm4, %v3646_v59  ;;  %v5215_v59 = vld [vmem:[%s9353_s14 + $0x108] sm:$0xff] }
 0xa32   :  { %6650 = vmatmul.mubr.msk.f32.vlgmr.msra.gmra.mrb[74].mxu1 %vm3649_vm9, %v3648_v60  ;;  %6659 = vmatmul.mubr.msk.f32.vlgmr.msra.gmra.mrb[74].mxu0 %vm3649_vm9, %v3735_v61  ;;  %v5204_v60 = vld [vmem:[%s9353_s14 + $0xd0] sm:$0xff]  ;;  %v5205_v61 = vld [vmem:[%s9353_s14 + $0xd8] sm:$0xff] }
 0xa33   :  { %7210 = vmatprep.subr.bf16.mxu0 %v7526_v3  ;;  %6672 = vmatprep.mubr.msk.f32.mxu0 %vm7527_vm0, %v7528_v6 }
 0xa34   :  { %7206 = vmatprep.subr.bf16.mxu1 %v7526_v3  ;;  %6665 = vmatprep.mubr.msk.f32.mxu1 %vm7527_vm0, %v7528_v6 }
 0xb05   :  { %v6651_v62 = vpop.f32.mrb[74].mxu1  ;;  %v6660_v12 = vpop.f32.mrb[74].mxu0 }
 0xb06   :  { %v3818_v15 = vmax.f32 %v6651_v62, %v6660_v12  ;;  %v3725_v63 = vpop.f32.mrb[75].mxu1  ;;  %v3808_v0 = vpop.f32.mrb[75].mxu0  ;;  %v7271_v62 = vpack.c.bf16 %v5215_v59, %v5214_v2  ;;  %v7258_v12 = vpack.c.bf16 %v5205_v61, %v5204_v60 }
 0xb07   :  { %v3817_v1 = vmax.f32 %v3725_v63, %v3808_v0  ;;  %v5217_v63 = vld [vmem:[%s9353_s14 + $0x118] sm:$0xff]  ;;  %v5206_v0 = vld [vmem:[%s9353_s14 + $0xe0] sm:$0xff] }
 0xb09   :  { %v8987_v11 = vpack.c.bf16 %v3818_v15, %v3817_v1  ;;  %v5216_v15 = vld [vmem:[%s9353_s14 + $0x110] sm:$0xff]  ;;  %v5207_v1 = vld [vmem:[%s9353_s14 + $0xe8] sm:$0xff] }
 0xb0a   :  { %v7274_v8 = vpack.c.bf16 %v5217_v63, %v5216_v15  ;;  %v7261_v9 = vpack.c.bf16 %v5207_v1, %v5206_v0  ;;  %v4642_v63 = vld [vmem:[%s9355_s16 + $0x60] sm:$0xff]  ;;  %v4643_v0 = vld [vmem:[%s9355_s16 + $0x68] sm:$0xff] }
 0xb0b   :  { %7213 = vmatpush3.bf16.msk.msra.mxu0 %vm8977_vm11, %v8987_v11  ;;  %7209 = vmatpush3.bf16.msk.msra.mxu1 %vm8977_vm11, %v8987_v11  ;;  %v7320_v1 = vpack.c.bf16 %v4643_v0, %v4642_v63 }
 0xb0c   :  { %7214 = vmatprep.subr.bf16.mxu1 %v7526_v3  ;;  %7229 = vmatprep.subr.bf16.mxu0 %v7526_v3 }
 0xb0e   :  { %6673 = vmatmul.mubr.msk.f32.vlgmr.msra.gmra.mrb[76].mxu0 %vm3820_vm12, %v5180_v14  ;;  %6666 = vmatmul.mubr.msk.f32.vlgmr.msra.gmra.mrb[76].mxu1 %vm3820_vm12, %v3819_v16  ;;  %v5218_v14 = vld [vmem:[%s9353_s14 + $0x120] sm:$0xff]  ;;  %v5219_v16 = vld [vmem:[%s9353_s14 + $0x128] sm:$0xff] }
 0xb0f   :  { %7216 = vmatpush3.bf16.msra.mxu1 %v7215_v17  ;;  %6695 = vmatprep.mubr.msk.f32.mxu1 %vm7527_vm0, %v7528_v6  ;;  %v7277_v17 = vpack.c.bf16 %v5219_v16, %v5218_v14  ;;  %v4728_v14 = vld [vmem:[%s9357_s18 + $0x8] sm:$0xff]  ;;  %v4729_v16 = vld [vmem:[%s9357_s18 + $0x10] sm:$0xff] }
 0xb10   :  { %7217 = vmatprep.subr.bf16.mxu1 %v7526_v3  ;;  %6718 = vmatprep.mubr.msk.f32.mxu0 %vm7527_vm0, %v7528_v6 }
 0xb11   :  { %7231 = vmatpush3.bf16.msra.mxu0 %v7230_v29  ;;  %v5228_v29 = vld [vmem:[%s9353_s14 + $0x150] sm:$0xff] }
 0xb12   :  { %7232 = vmatprep.subr.bf16.mxu0 %v7526_v3  ;;  %v7290_v13 = vpack.c.bf16 %v5229_v30, %v5228_v29  ;;  %v4735_v29 = vld [vmem:[%s9357_s18 + $0x40] sm:$0xff]  ;;  %v4736_v30 = vld [vmem:[%s9357_s18 + $0x48] sm:$0xff] }
 0xb13   :  { %7219 = vmatpush3.bf16.msra.mxu1 %v7218_v20  ;;  %v7280_v20 = vpack.c.bf16 %v5221_v19, %v5220_v18  ;;  %v4730_v18 = vld [vmem:[%s9357_s18 + $0x18] sm:$0xff] }
 0xb14   :  { %7220 = vmatprep.subr.bf16.mxu1 %v7526_v3  ;;  %v7326_v19 = vpack.c.bf16 %v4730_v18, %v4729_v16 }
 0xb15   :  { %7234 = vmatpush3.bf16.msra.mxu0 %v7233_v31  ;;  %v5230_v31 = vld [vmem:[%s9353_s14 + $0x160] sm:$0xff] }
 0xb16   :  { %7235 = vmatprep.subr.bf16.mxu0 %v7526_v3  ;;  %v7293_v33 = vpack.c.bf16 %v5231_v32, %v5230_v31 }
 0xb17   :  { %7222 = vmatpush3.bf16.msra.mxu1 %v7221_v23 }
 0xb18   :  { %7223 = vmatprep.subr.bf16.mxu1 %v7526_v3 }
 0xb19   :  { %7237 = vmatpush3.bf16.msra.mxu0 %v7236_v34  ;;  %v5232_v34 = vld [vmem:[%s9353_s14 + $0x170] sm:$0xff] }
 0xb1a   :  { %7238 = vmatprep.subr.bf16.mxu0 %v7526_v3  ;;  %v7296_v36 = vpack.c.bf16 %v5233_v35, %v5232_v34 }
 0xb1b   :  { %7225 = vmatpush3.bf16.msra.mxu1 %v7224_v4  ;;  %v5226_v4 = vld [vmem:[%s9353_s14 + $0x140] sm:$0xff] }
 0xb1c   :  { %7226 = vmatprep.subr.bf16.mxu1 %v7526_v3  ;;  %v7287_v10 = vpack.c.bf16 %v5227_v26, %v5226_v4  ;;  %v5237_v26 = vld [vmem:[%s9354_s15] ss:$0 sm:$0xff] }
 0xb1d   :  { %7240 = vmatpush3.bf16.msra.mxu0 %v7239_v37  ;;  %v5234_v37 = vld [vmem:[%s9353_s14 + $0x180] sm:$0xff] }
 0xb1e   :  { %7241 = vmatprep.subr.bf16.mxu0 %v7526_v3  ;;  %v7299_v39 = vpack.c.bf16 %v5235_v38, %v5234_v37 }
 0xb1f   :  { %7228 = vmatpush3.bf16.msra.mxu1 %v7227_v7 }
 0xb20   :  { %7244 = vmatprep.subr.bf16.mxu1 %v7526_v3 }
 0xb21   :  { %7243 = vmatpush3.bf16.msra.mxu0 %v7242_v40  ;;  %v4630_v40 = vld [vmem:[%s9355_s16] sm:$0xff] }
 0xb22   :  { %7248 = vmatprep.subr.bf16.mxu0 %v7526_v3 }
 0xbe1   :  { %v3979_v44 = vpop.f32.mrb[76].mxu0  ;;  %v3894_v45 = vpop.f32.mrb[76].mxu1 }
 0xbe2   :  { %6696 = vmatmul.mubr.msk.f32.vlgmr.msra.gmra.mrb[78].mxu1 %vm3994_vm13, %v3979_v44  ;;  %v6674_v48 = vpop.f32.mrb[77].mxu0  ;;  %6719 = vmatmul.mubr.msk.f32.vlgmr.msra.gmra.mrb[78].mxu0 %vm3994_vm13, %v3894_v45  ;;  %v6667_v49 = vpop.f32.mrb[77].mxu1  ;;  %v4633_v44 = vld [vmem:[%s9355_s16 + $0x18] sm:$0xff] }
 0xbe3   :  { %7247 = vmatpush3.bf16.msk.msra.mxu1 %vm8977_vm11, %v8987_v11  ;;  %6725 = vmatprep.mubr.msk.f32.mxu1 %vm7527_vm0, %v7528_v6  ;;  %v7305_v45 = vpack.c.bf16 %v4633_v44, %v4632_v42  ;;  %v7308_v48 = vpack.c.bf16 %v4635_v47, %v4634_v46  ;;  %v4636_v49 = vld [vmem:[%s9355_s16 + $0x30] sm:$0xff] }
 0xbe4   :  { %7263 = vmatprep.subr.bf16.mxu1 %v7526_v3  ;;  %7250 = vmatpush3.bf16.msra.mxu0 %v7249_v43  ;;  %v7302_v43 = vpack.c.bf16 %v4631_v41, %v4630_v40 }
 0xbe5   :  { %7251 = vmatprep.subr.bf16.mxu0 %v7526_v3  ;;  %6748 = vmatprep.mubr.msk.f32.mxu0 %vm7527_vm0, %v7528_v6 }
 0xbe6   :  { %6726 = vmatmul.mubr.msk.f32.vlgmr.msra.gmra.mrb[80].mxu1 %vm3820_vm12, %v5195_v50  ;;  %v4637_v50 = vld [vmem:[%s9355_s16 + $0x38] sm:$0xff] }
 0xbe7   :  { %7266 = vmatpush3.bf16.msk.msra.mxu1 %vm8977_vm11, %v8987_v11  ;;  %6755 = vmatprep.mubr.msk.f32.mxu1 %vm7527_vm0, %v7528_v6 }
 0xbe8   :  { %7253 = vmatpush3.bf16.msra.mxu0 %v7252_v51  ;;  %7267 = vmatprep.subr.bf16.mxu1 %v7526_v3  ;;  %v7311_v51 = vpack.c.bf16 %v4637_v50, %v4636_v49 }
 0xbe9   :  { %7254 = vmatprep.subr.bf16.mxu0 %v7526_v3 }
 0xbea   :  { %6756 = vmatmul.mubr.msk.f32.vlgmr.msra.gmra.mrb[82].mxu1 %vm3820_vm12, %v5209_v56  ;;  %v4641_v56 = vld [vmem:[%s9355_s16 + $0x58] sm:$0xff] }
 0xbeb   :  { %7269 = vmatpush3.bf16.msra.mxu1 %v7268_v57  ;;  %6778 = vmatprep.mubr.msk.f32.mxu1 %vm7527_vm0, %v7528_v6  ;;  %v7317_v57 = vpack.c.bf16 %v4641_v56, %v4640_v55 }
 0xbec   :  { %7256 = vmatpush3.bf16.msra.mxu0 %v7255_v58  ;;  %7270 = vmatprep.subr.bf16.mxu1 %v7526_v3 }
 0xbed   :  { %7257 = vmatprep.subr.bf16.mxu0 %v7526_v3 }
 0xbef   :  { %7272 = vmatpush3.bf16.msra.mxu1 %v7271_v62 }
 0xbf0   :  { %7259 = vmatpush3.bf16.msra.mxu0 %v7258_v12  ;;  %7273 = vmatprep.subr.bf16.mxu1 %v7526_v3 }
 0xbf1   :  { %7260 = vmatprep.subr.bf16.mxu0 %v7526_v3 }
 0xbf3   :  { %7275 = vmatpush3.bf16.msra.mxu1 %v7274_v8  ;;  %v4644_v8 = vld [vmem:[%s9355_s16 + $0x70] sm:$0xff] }
 0xbf4   :  { %7262 = vmatpush3.bf16.msra.mxu0 %v7261_v9  ;;  %7276 = vmatprep.subr.bf16.mxu1 %v7526_v3  ;;  %v4727_v9 = vld [vmem:[%s9357_s18] sm:$0xff] }
 0xbf5   :  { %7282 = vmatprep.subr.bf16.mxu0 %v7526_v3 }
 0xbf7   :  { %7278 = vmatpush3.bf16.msra.mxu1 %v7277_v17  ;;  %v7323_v17 = vpack.c.bf16 %v4728_v14, %v4727_v9 }
 0xbf8   :  { %7279 = vmatprep.subr.bf16.mxu1 %v7526_v3 }
 0xbfb   :  { %7281 = vmatpush3.bf16.msra.mxu1 %v7280_v20  ;;  %v4731_v20 = vld [vmem:[%s9357_s18 + $0x20] sm:$0xff] }
 0xbfc   :  { %7301 = vmatprep.subr.bf16.mxu1 %v7526_v3 }
 0xcb5   :  { %v4064_v21 = vpop.f32.mrb[78].mxu1  ;;  %v4137_v22 = vpop.f32.mrb[78].mxu0 }
 0xcb6   :  { %v6697_v23 = vpop.f32.mrb[79].mxu1  ;;  %v9169_v24 = vadd.f32 %v4137_v22, %v4064_v21  ;;  %v6720_v25 = vpop.f32.mrb[79].mxu0  ;;  %v4732_v21 = vld [vmem:[%s9357_s18 + $0x28] sm:$0xff] }
 0xcb7   :  { %v7329_v22 = vpack.c.bf16 %v4732_v21, %v4731_v20  ;;  %v4733_v23 = vld [vmem:[%s9357_s18 + $0x30] sm:$0xff] }
 0xcb9   :  { %v4212_v27 = vpop.f32.mrb[80].mxu1 }
 0xcba   :  { %6749 = vmatmul.mubr.msk.f32.vlgmr.msra.gmra.mrb[80].mxu0 %vm3994_vm13, %v4212_v27  ;;  %v6727_v7 = vpop.f32.mrb[81].mxu1 }
 0xcbb   :  { %7285 = vmatpush3.bf16.msk.msra.mxu0 %vm8977_vm11, %v8987_v11  ;;  %6785 = vmatprep.mubr.msk.f32.mxu0 %vm7527_vm0, %v7528_v6 }
 0xcbc   :  { %7286 = vmatprep.subr.bf16.mxu0 %v7526_v3 }
 0xcbd   :  { %v4372_v5 = vpop.f32.mrb[82].mxu1 }
 0xcbe   :  { %6779 = vmatmul.mubr.msk.f32.vlgmr.msra.gmra.mrb[84].mxu1 %vm3994_vm13, %v4372_v5  ;;  %6786 = vmatmul.mubr.msk.f32.vlgmr.msra.gmra.mrb[82].mxu0 %vm3820_vm12, %v5223_v28  ;;  %v6757_v11 = vpop.f32.mrb[83].mxu1  ;;  %v4737_v5 = vld [vmem:[%s9357_s18 + $0x50] sm:$0xf] }
 0xcbf   :  { %7288 = vmatpush3.bf16.msra.mxu0 %v7287_v10  ;;  %6808 = vmatprep.mubr.msk.f32.mxu0 %vm7527_vm0, %v7528_v6  ;;  %v5238_v11 = vld [vmem:[%s9356_s17] ss:$0 sm:$0xff] }
 0xcc0   :  { %7289 = vmatprep.subr.bf16.mxu0 %v7526_v3  ;;  %6841 = vmatprep.mubr.msk.f32.mxu1 %vm7527_vm0, %v7528_v6 }
 0xcc1   :  { %7303 = vmatpush3.bf16.msra.mxu1 %v7302_v43 }
 0xcc2   :  { %7304 = vmatprep.subr.bf16.mxu1 %v7526_v3 }
 0xcc3   :  { %7291 = vmatpush3.bf16.msra.mxu0 %v7290_v13 }
 0xcc4   :  { %7292 = vmatprep.subr.bf16.mxu0 %v7526_v3 }
 0xcc5   :  { %7306 = vmatpush3.bf16.msra.mxu1 %v7305_v45 }
 0xcc6   :  { %7307 = vmatprep.subr.bf16.mxu1 %v7526_v3 }
 0xcc7   :  { %7294 = vmatpush3.bf16.msra.mxu0 %v7293_v33 }
 0xcc8   :  { %7295 = vmatprep.subr.bf16.mxu0 %v7526_v3 }
 0xcc9   :  { %7309 = vmatpush3.bf16.msra.mxu1 %v7308_v48 }
 0xcca   :  { %7310 = vmatprep.subr.bf16.mxu1 %v7526_v3 }
 0xccb   :  { %7297 = vmatpush3.bf16.msra.mxu0 %v7296_v36 }
 0xccc   :  { %7298 = vmatprep.subr.bf16.mxu0 %v7526_v3 }
 0xccd   :  { %7312 = vmatpush3.bf16.msra.mxu1 %v7311_v51 }
 0xcce   :  { %7313 = vmatprep.subr.bf16.mxu1 %v7526_v3 }
 0xccf   :  { %7300 = vmatpush3.bf16.msra.mxu0 %v7299_v39 }
 0xcd0   :  { %7322 = vmatprep.subr.bf16.mxu0 %v7526_v3 }
 0xcd1   :  { %7315 = vmatpush3.bf16.msra.mxu1 %v7314_v54 }
 0xcd2   :  { %7316 = vmatprep.subr.bf16.mxu1 %v7526_v3 }
 0xcd5   :  { %7318 = vmatpush3.bf16.msra.mxu1 %v7317_v57 }
 0xcd6   :  { %7319 = vmatprep.subr.bf16.mxu1 %v7526_v3 }
 0xcd9   :  { %7321 = vmatpush3.bf16.msra.mxu1 %v7320_v1 }
 0xcda   :  { %6839 = vmatprep.subr.mxu1 %v7528_v6 }
 0xcdd   :  { %6840 = vmatpush3.msra.mxu1 %v4644_v8 }
 0xd8d   :  { %v4296_v58 = vpop.f32.mrb[80].mxu0 }
 0xd8e   :  { %v4300_v2 = vadd.f32 %v4296_v58, %v9169_v24  ;;  %v6750_v59 = vpop.f32.mrb[81].mxu0  ;;  %v4734_v24 = vld [vmem:[%s9357_s18 + $0x38] sm:$0xff]  ;;  %s7502_s18 = scalar_lea.vmem %s4830_s12, 32 }
 0xd8f   :  { %v7332_v25 = vpack.c.bf16 %v4734_v24, %v4733_v23  ;;  %p7503_p0 = scmp.ne.s32.totalorder %s4830_s12, %s7502_s18  ;;  %p7508_p2 = scmp.lt.s32.totalorder %s7502_s18, %s7502_s18 }
 0xd91   :  { %v4456_v60 = vpop.f32.mrb[84].mxu1  ;;  %v4532_v61 = vpop.f32.mrb[82].mxu0  ;;  %p7509_p3 = por %p7508_p2, %p7507_p1 }
 0xd92   :  { %v4460_v62 = vadd.f32 %v4456_v60, %v4300_v2  ;;  %6809 = vmatmul.mubr.msk.f32.vlgmr.msra.gmra.mrb[84].mxu0 %vm3994_vm13, %v4532_v61  ;;  %v6787_v12 = vpop.f32.mrb[83].mxu0  ;;  %v6780_v15 = vpop.f32.mrb[85].mxu1 }
 0xd93   :  { %6866 = vmatprep.mubr.msk.f32.mxu0 %vm7527_vm0, %v7528_v6  ;;  %7324 = vmatpush3.bf16.msra.mxu0 %v7323_v17  ;;  %p7510_p4 = pnand %p7509_p3, %p7503_p0 }
 0xd94   :  { %7325 = vmatprep.subr.bf16.mxu0 %v7526_v3 }
 0xd97   :  { %7327 = vmatpush3.bf16.msra.mxu0 %v7326_v19 }
 0xd98   :  { %7328 = vmatprep.subr.bf16.mxu0 %v7526_v3 }
 0xd9b   :  { %7330 = vmatpush3.bf16.msra.mxu0 %v7329_v22 }
 0xd9c   :  { %7331 = vmatprep.subr.bf16.mxu0 %v7526_v3 }
 0xd9f   :  { %7333 = vmatpush3.bf16.msra.mxu0 %v7332_v25 }
 0xda0   :  { %7334 = vmatprep.subr.bf16.mxu0 %v7526_v3  ;;  %v7335_v3 = vpack.c.bf16 %v4736_v30, %v4735_v29 }
 0xda3   :  { %7336 = vmatpush3.bf16.msra.mxu0 %v7335_v3 }
 0xda4   :  { %6864 = vmatprep.subr.mxu0 %v7528_v6  ;;  %v5240_v6 = vld [vmem:[%s9358_s19] ss:$0 sm:$0xff] }
 0xda7   :  { %6865 = vmatpush3.msk.msra.mxu0 %vm2163_vm4, %v4737_v5 }
 0xe65   :  { %v4616_v4 = vpop.f32.mrb[84].mxu0 }
 0xe66   :  { %v4620_v27 = vadd.f32 %v4616_v4, %v4460_v62  ;;  %v6810_v7 = vpop.f32.mrb[85].mxu0 }
 0xe68   :  { %v4628_v28 = vadd.f32 %v5237_v26, %v4620_v27 }
 0xe6a   :  { %v4629_v10 = vmax.f32 %v4628_v28, 0.0 }
 0xe6c   :  { %6842 = vmatmul.mubr.msk.f32.vlgmr.msra.gmra.mrb[86].mxu1 %vm4652_vm14, %v4629_v10 }
 0xf3f   :  { %v4722_v13 = vpop.f32.mrb[86].mxu1 }
 0xf40   :  { %v4723_v31 = vadd.f32 %v5238_v11, %v4722_v13  ;;  %v6843_v32 = vpop.f32.mrb[87].mxu1 }
 0xf42   :  { %v4726_v33 = vmax.f32 %v4723_v31, 0.0 }
 0xf44   :  { %6867 = vmatmul.mubr.msk.f32.vlgmr.msra.gmra.mrb[86].mxu0 %vm2374_vm8, %v4726_v33 }
0x1017   :  { %v4817_v34 = vpop.f32.mrb[86].mxu0 }
0x1018   :  { %v4818_v35 = vadd.f32 %v5240_v6, %v4817_v34  ;;  %v6868_v36 = vpop.f32.mrb[87].mxu0 }
0x101a   :  { %4822 = vst.msk [vmem:[#allocation2] sm:$0x3] %vm4821_vm15, %v4818_v35 }
0x101b   :  { %7513 = shalt.err (!%p7510_p4)
}
0x101c   :  { %s7514_s27 = scalar_lea.hbm %s9359_s20, 32 }
0x101d   :  { %p7515_p5 = scmp.ne.s32.totalorder %s9359_s20, %s7514_s27  ;;  %p7518_p6 = scmp.lt.u32.totalorder %s7514_s27, %s9359_s20 }
0x101f   :  { %p7520_p7 = pnand %p7518_p6, %p7515_p5 }
0x1021   :  { %7523 = shalt.err (!%p7520_p7)
}
0x1022   :  { %4832 = dma.vmem_to_hbm [thread:$0]  %s4830_s12, 32, %s9359_s20, [#allocation3]  }
0x1023   :  { %7524 = dma.done.wait [#allocation3], 32  }
0x1024   :  { %7525 = vsyncadd [#allocation3], 4294967264 }
0x1025   :  { %4836 = vsyncpa [#allocation3], 1 }

</bundles_post_ra>
